<compile_context>
chip_gen: v6e
topology: v6e:2x2x1
jax: 0.10.0
libtpu: 0.0.40
codegen_flags: <defaults>
</compile_context>

<pallas_src>
import math
import functools

import jax
import jax.numpy as jnp
from jax.experimental import pallas as pl
from jax.experimental.pallas import tpu as pltpu


# ----------------------------- Pallas kernel -------------------------------

def _fused_self_attention_kernel(x_ref, wq_ref, wk_ref, wv_ref, wu_ref, bu_ref,
                                 o_ref):
    """One batch element per grid step; QKV projection -> per-head softmax
    attention -> unifyheads projection, fully fused in VMEM.

    Block shapes:
      x_ref : (1, t, e)      wq/wk/wv_ref : (h, e, e)   (head-major)
      wu_ref: (h, e, e)      bu_ref       : (1, e)      o_ref: (1, t, e)
    The 1/sqrt(e) query scale is already folded into wq.
    """
    x = x_ref[0]                                    # (t, e), compute dtype
    cdt = x.dtype
    heads = wq_ref.shape[0]
    t, e = x.shape

    acc = jnp.zeros((t, e), jnp.float32)            # unifyheads accumulator
    for hh in range(heads):                         # static unroll (h known)
        # Per-head projections on the MXU with f32 accumulation.
        q = jnp.dot(x, wq_ref[hh], preferred_element_type=jnp.float32).astype(cdt)
        k = jnp.dot(x, wk_ref[hh], preferred_element_type=jnp.float32).astype(cdt)
        v = jnp.dot(x, wv_ref[hh], preferred_element_type=jnp.float32).astype(cdt)

        # Scores with the k-transpose folded into the contraction (no k.T).
        s = jax.lax.dot_general(q, k, (((1,), (1,)), ((), ())),
                                preferred_element_type=jnp.float32)   # (t, t)

        # Numerically-stable softmax, kept in f32; denominator on the EUP.
        s = s - jnp.max(s, axis=-1, keepdims=True)
        p = jnp.exp(s)
        p = p * pl.reciprocal(jnp.sum(p, axis=-1, keepdims=True), approx=True)

        o = jnp.dot(p.astype(cdt), v,
                    preferred_element_type=jnp.float32).astype(cdt)   # (t, e)

        # Fold this head's slice of unifyheads into the reduction over heads.
        acc = acc + jnp.dot(o, wu_ref[hh], preferred_element_type=jnp.float32)

    # Bias added once, outside the head loop (no redundant broadcasts).
    o_ref[0] = (acc + bu_ref[...].astype(jnp.float32)).astype(o_ref.dtype)


# ------------------------------ Wrappers ------------------------------------

def _padded_bytes(shape, dtype):
    """VMEM footprint of one block, accounting for (sublane, lane) tiling."""
    item = jnp.dtype(dtype).itemsize
    dims = list(shape)
    dims[-1] = -(-dims[-1] // 128) * 128
    if len(dims) >= 2:
        sub = 8 * max(1, 4 // item)                 # f32: 8, bf16: 16, int8: 32
        dims[-2] = -(-dims[-2] // sub) * sub
    n = 1
    for d in dims:
        n *= d
    return n * item


def self_attention_forward(x, params, compute_dtype=jnp.float32):
    """Forward pass matching former.modules.SelfAttention (mask=False)."""
    b, t, e = x.shape
    h = params["wq"].shape[0]
    x = x.astype(compute_dtype)
    out_dtype = jnp.float32

    block_bytes = (
        _padded_bytes((1, t, e), compute_dtype)            # x block
        + 4 * _padded_bytes((h, e, e), compute_dtype)      # wq, wk, wv, wu
        + _padded_bytes((1, e), jnp.float32)                # bias
        + _padded_bytes((1, t, e), out_dtype)               # out block
    )
    # x2 for double-buffering, +2 MiB headroom, capped well under v7x's 64 MiB.
    vmem_limit = int(min(max(2 * block_bytes + (2 << 20), 4 << 20), 32 << 20))

    return pl.pallas_call(
        _fused_self_attention_kernel,
        out_shape=jax.ShapeDtypeStruct((b, t, e), out_dtype),
        grid=(b,),
        in_specs=[
            pl.BlockSpec((1, t, e), lambda i: (i, 0, 0)),   # x: one batch row
            pl.BlockSpec((h, e, e), lambda i: (0, 0, 0)),   # wq (VMEM-resident)
            pl.BlockSpec((h, e, e), lambda i: (0, 0, 0)),   # wk
            pl.BlockSpec((h, e, e), lambda i: (0, 0, 0)),   # wv
            pl.BlockSpec((h, e, e), lambda i: (0, 0, 0)),   # wu
            pl.BlockSpec((1, e), lambda i: (0, 0)),         # bias
        ],
        out_specs=pl.BlockSpec((1, t, e), lambda i: (i, 0, 0)),
        compiler_params=pltpu.CompilerParams(
            dimension_semantics=("parallel",),
            vmem_limit_bytes=vmem_limit),
    )(x, params["wq"], params["wk"], params["wv"], params["wu"], params["bu"])


def prepare_params(raw, emb, heads, compute_dtype=jnp.float32):
    """Re-pack (emb, emb*heads) weights head-major; fold 1/sqrt(e) into W_q."""
    scale = 1.0 / math.sqrt(emb)

    def per_head(w):                                  # (e, h*e) -> (h, e, e)
        return jnp.transpose(w.reshape(emb, heads, emb), (1, 0, 2))

    return {
        "wq": per_head(raw["wq"] * scale).astype(compute_dtype),
        "wk": per_head(raw["wk"]).astype(compute_dtype),
        "wv": per_head(raw["wv"]).astype(compute_dtype),
        "wu": raw["wu"].reshape(heads, emb, emb).astype(compute_dtype),
        "bu": raw["bu"].reshape(1, emb).astype(jnp.float32),
    }


def init_params(key, emb, heads):
    k1, k2, k3, k4, k5 = jax.random.split(key, 5)
    s = 0.02
    return {
        "wk": s * jax.random.normal(k1, (emb, emb * heads), jnp.float32),
        "wq": s * jax.random.normal(k2, (emb, emb * heads), jnp.float32),
        "wv": s * jax.random.normal(k3, (emb, emb * heads), jnp.float32),
        "wu": s * jax.random.normal(k4, (emb * heads, emb), jnp.float32),
        "bu": s * jax.random.normal(k5, (emb,), jnp.float32),
    }


def reference(x, p, heads):
    b, t, e = x.shape
    h = heads
    k = (x @ p["wk"]).reshape(b, t, h, e).transpose(0, 2, 1, 3)
    q = (x @ p["wq"]).reshape(b, t, h, e).transpose(0, 2, 1, 3)
    v = (x @ p["wv"]).reshape(b, t, h, e).transpose(0, 2, 1, 3)
    q = q / math.sqrt(e)
    dot = jnp.einsum("bhqe,bhke->bhqk", q, k)
    dot = jax.nn.softmax(dot, axis=-1)
    o = jnp.einsum("bhqk,bhke->bhqe", dot, v)
    o = o.transpose(0, 2, 1, 3).reshape(b, t, h * e)
    return o @ p["wu"] + p["bu"]


if __name__ == "__main__":
    B, T, E, H = 2, 8, 32, 8
    key = jax.random.PRNGKey(0)
    kx, kp = jax.random.split(key)
    x = jax.random.normal(kx, (B, T, E), jnp.float32)
    raw = init_params(kp, E, H)
    expected = reference(x, raw, H)

    # f32 path (all generations).
    fwd32 = jax.jit(functools.partial(self_attention_forward,
                                      compute_dtype=jnp.float32))
    p32 = prepare_params(raw, E, H, jnp.float32)
    out32 = jax.block_until_ready(fwd32(x, p32))
    assert out32.shape == (B, T, E)
    err32 = float(jnp.max(jnp.abs(out32 - expected)))
    assert jnp.allclose(out32, expected, atol=2e-3, rtol=2e-3), err32

    # bf16 MXU-operand path (f32 accumulation / f32 softmax); valid on
    # v5e/v6e/v7x alike since all of them take bf16 MXU operands.
    fwd16 = jax.jit(functools.partial(self_attention_forward,
                                      compute_dtype=jnp.bfloat16))
    p16 = prepare_params(raw, E, H, jnp.bfloat16)
    out16 = jax.block_until_ready(fwd16(x, p16))
    assert out16.shape == (B, T, E)
    err16 = float(jnp.max(jnp.abs(out16 - expected)))
    assert jnp.allclose(out16, expected, atol=3e-2, rtol=3e-2), err16

    print("KERNEL_OK")
</pallas_src>

<mosaic_0001>
module attributes {stable_mosaic.version = 11 : i64} {
  func.func @_fused_self_attention_kernel(%arg0: i32, %arg1: memref<1x8x32xf32, #tpu.memory_space<vmem>>, %arg2: memref<8x32x32xf32, #tpu.memory_space<vmem>>, %arg3: memref<8x32x32xf32, #tpu.memory_space<vmem>>, %arg4: memref<8x32x32xf32, #tpu.memory_space<vmem>>, %arg5: memref<8x32x32xf32, #tpu.memory_space<vmem>>, %arg6: memref<1x32xf32, #tpu.memory_space<vmem>>, %arg7: memref<1x8x32xf32, #tpu.memory_space<vmem>>) attributes {dimension_semantics = [#tpu.dimension_semantics<parallel>], iteration_bounds = array<i64: 2>, scalar_prefetch = 0 : i64, scratch_operands = 0 : i64, tpu.core_type = #tpu.core_type<tc>, window_params = [{transform_indices = @transform_0, window_bounds = array<i64: 1, 8, 32>}, {pipeline_mode = #tpu.pipeline_mode<synchronous>, transform_indices = @transform_1, window_bounds = array<i64: 8, 32, 32>}, {pipeline_mode = #tpu.pipeline_mode<synchronous>, transform_indices = @transform_2, window_bounds = array<i64: 8, 32, 32>}, {pipeline_mode = #tpu.pipeline_mode<synchronous>, transform_indices = @transform_3, window_bounds = array<i64: 8, 32, 32>}, {pipeline_mode = #tpu.pipeline_mode<synchronous>, transform_indices = @transform_4, window_bounds = array<i64: 8, 32, 32>}, {pipeline_mode = #tpu.pipeline_mode<synchronous>, transform_indices = @transform_5, window_bounds = array<i64: 1, 32>}, {transform_indices = @transform_6, window_bounds = array<i64: 1, 8, 32>}]} {
    %c0 = arith.constant 0 : index
    %c0_0 = arith.constant 0 : index
    %c0_1 = arith.constant 0 : index
    %0 = vector.load %arg1[%c0, %c0_0, %c0_1] : memref<1x8x32xf32, #tpu.memory_space<vmem>>, vector<1x8x32xf32>
    %1 = vector.shape_cast %0 : vector<1x8x32xf32> to vector<8x32xf32>
    %cst = arith.constant 0.000000e+00 : f32
    %2 = vector.broadcast %cst : f32 to vector<8x32xf32>
    %c0_2 = arith.constant 0 : index
    %c0_3 = arith.constant 0 : index
    %c0_4 = arith.constant 0 : index
    %3 = vector.load %arg2[%c0_2, %c0_3, %c0_4] : memref<8x32x32xf32, #tpu.memory_space<vmem>>, vector<1x32x32xf32>
    %4 = vector.shape_cast %3 : vector<1x32x32xf32> to vector<32x32xf32>
    %cst_5 = arith.constant dense<0.000000e+00> : vector<8x32xf32>
    %5 = tpu.matmul %1, %4, %cst_5 {dimension_numbers = #tpu.dot_dimension_numbers<[1], [0], [0], [1], [0, 0, 1, 1], [], []>} : vector<8x32xf32>, vector<32x32xf32>, vector<8x32xf32> -> vector<8x32xf32>
    %c0_6 = arith.constant 0 : index
    %c0_7 = arith.constant 0 : index
    %c0_8 = arith.constant 0 : index
    %6 = vector.load %arg3[%c0_6, %c0_7, %c0_8] : memref<8x32x32xf32, #tpu.memory_space<vmem>>, vector<1x32x32xf32>
    %7 = vector.shape_cast %6 : vector<1x32x32xf32> to vector<32x32xf32>
    %cst_9 = arith.constant dense<0.000000e+00> : vector<8x32xf32>
    %8 = tpu.matmul %1, %7, %cst_9 {dimension_numbers = #tpu.dot_dimension_numbers<[1], [0], [0], [1], [0, 0, 1, 1], [], []>} : vector<8x32xf32>, vector<32x32xf32>, vector<8x32xf32> -> vector<8x32xf32>
    %c0_10 = arith.constant 0 : index
    %c0_11 = arith.constant 0 : index
    %c0_12 = arith.constant 0 : index
    %9 = vector.load %arg4[%c0_10, %c0_11, %c0_12] : memref<8x32x32xf32, #tpu.memory_space<vmem>>, vector<1x32x32xf32>
    %10 = vector.shape_cast %9 : vector<1x32x32xf32> to vector<32x32xf32>
    %cst_13 = arith.constant dense<0.000000e+00> : vector<8x32xf32>
    %11 = tpu.matmul %1, %10, %cst_13 {dimension_numbers = #tpu.dot_dimension_numbers<[1], [0], [0], [1], [0, 0, 1, 1], [], []>} : vector<8x32xf32>, vector<32x32xf32>, vector<8x32xf32> -> vector<8x32xf32>
    %cst_14 = arith.constant dense<0.000000e+00> : vector<8x8xf32>
    %12 = tpu.matmul %5, %8, %cst_14 {dimension_numbers = #tpu.dot_dimension_numbers<[1], [1], [0], [0], [0, 0, 1, 0], [], []>} : vector<8x32xf32>, vector<8x32xf32>, vector<8x8xf32> -> vector<8x8xf32>
    %cst_15 = arith.constant dense<0xFF800000> : vector<8xf32>
    %13 = vector.multi_reduction <maximumf>, %12, %cst_15 [1] : vector<8x8xf32> to vector<8xf32>
    %14 = vector.shape_cast %13 : vector<8xf32> to vector<8x1xf32>
    %15 = vector.broadcast %14 : vector<8x1xf32> to vector<8x8xf32>
    %16 = arith.subf %12, %15 : vector<8x8xf32>
    %17 = math.exp %16 : vector<8x8xf32>
    %cst_16 = arith.constant dense<0.000000e+00> : vector<8xf32>
    %18 = vector.multi_reduction <add>, %17, %cst_16 [1] : vector<8x8xf32> to vector<8xf32>
    %19 = vector.shape_cast %18 : vector<8xf32> to vector<8x1xf32>
    %20 = tpu.reciprocal %19 {approx = true} : vector<8x1xf32> -> vector<8x1xf32>
    %21 = vector.broadcast %20 : vector<8x1xf32> to vector<8x8xf32>
    %22 = arith.mulf %17, %21 : vector<8x8xf32>
    %cst_17 = arith.constant dense<0.000000e+00> : vector<8x32xf32>
    %23 = tpu.matmul %22, %11, %cst_17 {dimension_numbers = #tpu.dot_dimension_numbers<[1], [0], [0], [1], [0, 0, 1, 1], [], []>} : vector<8x8xf32>, vector<8x32xf32>, vector<8x32xf32> -> vector<8x32xf32>
    %c0_18 = arith.constant 0 : index
    %c0_19 = arith.constant 0 : index
    %c0_20 = arith.constant 0 : index
    %24 = vector.load %arg5[%c0_18, %c0_19, %c0_20] : memref<8x32x32xf32, #tpu.memory_space<vmem>>, vector<1x32x32xf32>
    %25 = vector.shape_cast %24 : vector<1x32x32xf32> to vector<32x32xf32>
    %cst_21 = arith.constant dense<0.000000e+00> : vector<8x32xf32>
    %26 = tpu.matmul %23, %25, %cst_21 {dimension_numbers = #tpu.dot_dimension_numbers<[1], [0], [0], [1], [0, 0, 1, 1], [], []>} : vector<8x32xf32>, vector<32x32xf32>, vector<8x32xf32> -> vector<8x32xf32>
    %27 = arith.addf %2, %26 : vector<8x32xf32>
    %c1 = arith.constant 1 : index
    %c0_22 = arith.constant 0 : index
    %c0_23 = arith.constant 0 : index
    %28 = vector.load %arg2[%c1, %c0_22, %c0_23] : memref<8x32x32xf32, #tpu.memory_space<vmem>>, vector<1x32x32xf32>
    %29 = vector.shape_cast %28 : vector<1x32x32xf32> to vector<32x32xf32>
    %cst_24 = arith.constant dense<0.000000e+00> : vector<8x32xf32>
    %30 = tpu.matmul %1, %29, %cst_24 {dimension_numbers = #tpu.dot_dimension_numbers<[1], [0], [0], [1], [0, 0, 1, 1], [], []>} : vector<8x32xf32>, vector<32x32xf32>, vector<8x32xf32> -> vector<8x32xf32>
    %c1_25 = arith.constant 1 : index
    %c0_26 = arith.constant 0 : index
    %c0_27 = arith.constant 0 : index
    %31 = vector.load %arg3[%c1_25, %c0_26, %c0_27] : memref<8x32x32xf32, #tpu.memory_space<vmem>>, vector<1x32x32xf32>
    %32 = vector.shape_cast %31 : vector<1x32x32xf32> to vector<32x32xf32>
    %cst_28 = arith.constant dense<0.000000e+00> : vector<8x32xf32>
    %33 = tpu.matmul %1, %32, %cst_28 {dimension_numbers = #tpu.dot_dimension_numbers<[1], [0], [0], [1], [0, 0, 1, 1], [], []>} : vector<8x32xf32>, vector<32x32xf32>, vector<8x32xf32> -> vector<8x32xf32>
    %c1_29 = arith.constant 1 : index
    %c0_30 = arith.constant 0 : index
    %c0_31 = arith.constant 0 : index
    %34 = vector.load %arg4[%c1_29, %c0_30, %c0_31] : memref<8x32x32xf32, #tpu.memory_space<vmem>>, vector<1x32x32xf32>
    %35 = vector.shape_cast %34 : vector<1x32x32xf32> to vector<32x32xf32>
    %cst_32 = arith.constant dense<0.000000e+00> : vector<8x32xf32>
    %36 = tpu.matmul %1, %35, %cst_32 {dimension_numbers = #tpu.dot_dimension_numbers<[1], [0], [0], [1], [0, 0, 1, 1], [], []>} : vector<8x32xf32>, vector<32x32xf32>, vector<8x32xf32> -> vector<8x32xf32>
    %cst_33 = arith.constant dense<0.000000e+00> : vector<8x8xf32>
    %37 = tpu.matmul %30, %33, %cst_33 {dimension_numbers = #tpu.dot_dimension_numbers<[1], [1], [0], [0], [0, 0, 1, 0], [], []>} : vector<8x32xf32>, vector<8x32xf32>, vector<8x8xf32> -> vector<8x8xf32>
    %cst_34 = arith.constant dense<0xFF800000> : vector<8xf32>
    %38 = vector.multi_reduction <maximumf>, %37, %cst_34 [1] : vector<8x8xf32> to vector<8xf32>
    %39 = vector.shape_cast %38 : vector<8xf32> to vector<8x1xf32>
    %40 = vector.broadcast %39 : vector<8x1xf32> to vector<8x8xf32>
    %41 = arith.subf %37, %40 : vector<8x8xf32>
    %42 = math.exp %41 : vector<8x8xf32>
    %cst_35 = arith.constant dense<0.000000e+00> : vector<8xf32>
    %43 = vector.multi_reduction <add>, %42, %cst_35 [1] : vector<8x8xf32> to vector<8xf32>
    %44 = vector.shape_cast %43 : vector<8xf32> to vector<8x1xf32>
    %45 = tpu.reciprocal %44 {approx = true} : vector<8x1xf32> -> vector<8x1xf32>
    %46 = vector.broadcast %45 : vector<8x1xf32> to vector<8x8xf32>
    %47 = arith.mulf %42, %46 : vector<8x8xf32>
    %cst_36 = arith.constant dense<0.000000e+00> : vector<8x32xf32>
    %48 = tpu.matmul %47, %36, %cst_36 {dimension_numbers = #tpu.dot_dimension_numbers<[1], [0], [0], [1], [0, 0, 1, 1], [], []>} : vector<8x8xf32>, vector<8x32xf32>, vector<8x32xf32> -> vector<8x32xf32>
    %c1_37 = arith.constant 1 : index
    %c0_38 = arith.constant 0 : index
    %c0_39 = arith.constant 0 : index
    %49 = vector.load %arg5[%c1_37, %c0_38, %c0_39] : memref<8x32x32xf32, #tpu.memory_space<vmem>>, vector<1x32x32xf32>
    %50 = vector.shape_cast %49 : vector<1x32x32xf32> to vector<32x32xf32>
    %cst_40 = arith.constant dense<0.000000e+00> : vector<8x32xf32>
    %51 = tpu.matmul %48, %50, %cst_40 {dimension_numbers = #tpu.dot_dimension_numbers<[1], [0], [0], [1], [0, 0, 1, 1], [], []>} : vector<8x32xf32>, vector<32x32xf32>, vector<8x32xf32> -> vector<8x32xf32>
    %52 = arith.addf %27, %51 : vector<8x32xf32>
    %c2 = arith.constant 2 : index
    %c0_41 = arith.constant 0 : index
    %c0_42 = arith.constant 0 : index
    %53 = vector.load %arg2[%c2, %c0_41, %c0_42] : memref<8x32x32xf32, #tpu.memory_space<vmem>>, vector<1x32x32xf32>
    %54 = vector.shape_cast %53 : vector<1x32x32xf32> to vector<32x32xf32>
    %cst_43 = arith.constant dense<0.000000e+00> : vector<8x32xf32>
    %55 = tpu.matmul %1, %54, %cst_43 {dimension_numbers = #tpu.dot_dimension_numbers<[1], [0], [0], [1], [0, 0, 1, 1], [], []>} : vector<8x32xf32>, vector<32x32xf32>, vector<8x32xf32> -> vector<8x32xf32>
    %c2_44 = arith.constant 2 : index
    %c0_45 = arith.constant 0 : index
    %c0_46 = arith.constant 0 : index
    %56 = vector.load %arg3[%c2_44, %c0_45, %c0_46] : memref<8x32x32xf32, #tpu.memory_space<vmem>>, vector<1x32x32xf32>
    %57 = vector.shape_cast %56 : vector<1x32x32xf32> to vector<32x32xf32>
    %cst_47 = arith.constant dense<0.000000e+00> : vector<8x32xf32>
    %58 = tpu.matmul %1, %57, %cst_47 {dimension_numbers = #tpu.dot_dimension_numbers<[1], [0], [0], [1], [0, 0, 1, 1], [], []>} : vector<8x32xf32>, vector<32x32xf32>, vector<8x32xf32> -> vector<8x32xf32>
    %c2_48 = arith.constant 2 : index
    %c0_49 = arith.constant 0 : index
    %c0_50 = arith.constant 0 : index
    %59 = vector.load %arg4[%c2_48, %c0_49, %c0_50] : memref<8x32x32xf32, #tpu.memory_space<vmem>>, vector<1x32x32xf32>
    %60 = vector.shape_cast %59 : vector<1x32x32xf32> to vector<32x32xf32>
    %cst_51 = arith.constant dense<0.000000e+00> : vector<8x32xf32>
    %61 = tpu.matmul %1, %60, %cst_51 {dimension_numbers = #tpu.dot_dimension_numbers<[1], [0], [0], [1], [0, 0, 1, 1], [], []>} : vector<8x32xf32>, vector<32x32xf32>, vector<8x32xf32> -> vector<8x32xf32>
    %cst_52 = arith.constant dense<0.000000e+00> : vector<8x8xf32>
    %62 = tpu.matmul %55, %58, %cst_52 {dimension_numbers = #tpu.dot_dimension_numbers<[1], [1], [0], [0], [0, 0, 1, 0], [], []>} : vector<8x32xf32>, vector<8x32xf32>, vector<8x8xf32> -> vector<8x8xf32>
    %cst_53 = arith.constant dense<0xFF800000> : vector<8xf32>
    %63 = vector.multi_reduction <maximumf>, %62, %cst_53 [1] : vector<8x8xf32> to vector<8xf32>
    %64 = vector.shape_cast %63 : vector<8xf32> to vector<8x1xf32>
    %65 = vector.broadcast %64 : vector<8x1xf32> to vector<8x8xf32>
    %66 = arith.subf %62, %65 : vector<8x8xf32>
    %67 = math.exp %66 : vector<8x8xf32>
    %cst_54 = arith.constant dense<0.000000e+00> : vector<8xf32>
    %68 = vector.multi_reduction <add>, %67, %cst_54 [1] : vector<8x8xf32> to vector<8xf32>
    %69 = vector.shape_cast %68 : vector<8xf32> to vector<8x1xf32>
    %70 = tpu.reciprocal %69 {approx = true} : vector<8x1xf32> -> vector<8x1xf32>
    %71 = vector.broadcast %70 : vector<8x1xf32> to vector<8x8xf32>
    %72 = arith.mulf %67, %71 : vector<8x8xf32>
    %cst_55 = arith.constant dense<0.000000e+00> : vector<8x32xf32>
    %73 = tpu.matmul %72, %61, %cst_55 {dimension_numbers = #tpu.dot_dimension_numbers<[1], [0], [0], [1], [0, 0, 1, 1], [], []>} : vector<8x8xf32>, vector<8x32xf32>, vector<8x32xf32> -> vector<8x32xf32>
    %c2_56 = arith.constant 2 : index
    %c0_57 = arith.constant 0 : index
    %c0_58 = arith.constant 0 : index
    %74 = vector.load %arg5[%c2_56, %c0_57, %c0_58] : memref<8x32x32xf32, #tpu.memory_space<vmem>>, vector<1x32x32xf32>
    %75 = vector.shape_cast %74 : vector<1x32x32xf32> to vector<32x32xf32>
    %cst_59 = arith.constant dense<0.000000e+00> : vector<8x32xf32>
    %76 = tpu.matmul %73, %75, %cst_59 {dimension_numbers = #tpu.dot_dimension_numbers<[1], [0], [0], [1], [0, 0, 1, 1], [], []>} : vector<8x32xf32>, vector<32x32xf32>, vector<8x32xf32> -> vector<8x32xf32>
    %77 = arith.addf %52, %76 : vector<8x32xf32>
    %c3 = arith.constant 3 : index
    %c0_60 = arith.constant 0 : index
    %c0_61 = arith.constant 0 : index
    %78 = vector.load %arg2[%c3, %c0_60, %c0_61] : memref<8x32x32xf32, #tpu.memory_space<vmem>>, vector<1x32x32xf32>
    %79 = vector.shape_cast %78 : vector<1x32x32xf32> to vector<32x32xf32>
    %cst_62 = arith.constant dense<0.000000e+00> : vector<8x32xf32>
    %80 = tpu.matmul %1, %79, %cst_62 {dimension_numbers = #tpu.dot_dimension_numbers<[1], [0], [0], [1], [0, 0, 1, 1], [], []>} : vector<8x32xf32>, vector<32x32xf32>, vector<8x32xf32> -> vector<8x32xf32>
    %c3_63 = arith.constant 3 : index
    %c0_64 = arith.constant 0 : index
    %c0_65 = arith.constant 0 : index
    %81 = vector.load %arg3[%c3_63, %c0_64, %c0_65] : memref<8x32x32xf32, #tpu.memory_space<vmem>>, vector<1x32x32xf32>
    %82 = vector.shape_cast %81 : vector<1x32x32xf32> to vector<32x32xf32>
    %cst_66 = arith.constant dense<0.000000e+00> : vector<8x32xf32>
    %83 = tpu.matmul %1, %82, %cst_66 {dimension_numbers = #tpu.dot_dimension_numbers<[1], [0], [0], [1], [0, 0, 1, 1], [], []>} : vector<8x32xf32>, vector<32x32xf32>, vector<8x32xf32> -> vector<8x32xf32>
    %c3_67 = arith.constant 3 : index
    %c0_68 = arith.constant 0 : index
    %c0_69 = arith.constant 0 : index
    %84 = vector.load %arg4[%c3_67, %c0_68, %c0_69] : memref<8x32x32xf32, #tpu.memory_space<vmem>>, vector<1x32x32xf32>
    %85 = vector.shape_cast %84 : vector<1x32x32xf32> to vector<32x32xf32>
    %cst_70 = arith.constant dense<0.000000e+00> : vector<8x32xf32>
    %86 = tpu.matmul %1, %85, %cst_70 {dimension_numbers = #tpu.dot_dimension_numbers<[1], [0], [0], [1], [0, 0, 1, 1], [], []>} : vector<8x32xf32>, vector<32x32xf32>, vector<8x32xf32> -> vector<8x32xf32>
    %cst_71 = arith.constant dense<0.000000e+00> : vector<8x8xf32>
    %87 = tpu.matmul %80, %83, %cst_71 {dimension_numbers = #tpu.dot_dimension_numbers<[1], [1], [0], [0], [0, 0, 1, 0], [], []>} : vector<8x32xf32>, vector<8x32xf32>, vector<8x8xf32> -> vector<8x8xf32>
    %cst_72 = arith.constant dense<0xFF800000> : vector<8xf32>
    %88 = vector.multi_reduction <maximumf>, %87, %cst_72 [1] : vector<8x8xf32> to vector<8xf32>
    %89 = vector.shape_cast %88 : vector<8xf32> to vector<8x1xf32>
    %90 = vector.broadcast %89 : vector<8x1xf32> to vector<8x8xf32>
    %91 = arith.subf %87, %90 : vector<8x8xf32>
    %92 = math.exp %91 : vector<8x8xf32>
    %cst_73 = arith.constant dense<0.000000e+00> : vector<8xf32>
    %93 = vector.multi_reduction <add>, %92, %cst_73 [1] : vector<8x8xf32> to vector<8xf32>
    %94 = vector.shape_cast %93 : vector<8xf32> to vector<8x1xf32>
    %95 = tpu.reciprocal %94 {approx = true} : vector<8x1xf32> -> vector<8x1xf32>
    %96 = vector.broadcast %95 : vector<8x1xf32> to vector<8x8xf32>
    %97 = arith.mulf %92, %96 : vector<8x8xf32>
    %cst_74 = arith.constant dense<0.000000e+00> : vector<8x32xf32>
    %98 = tpu.matmul %97, %86, %cst_74 {dimension_numbers = #tpu.dot_dimension_numbers<[1], [0], [0], [1], [0, 0, 1, 1], [], []>} : vector<8x8xf32>, vector<8x32xf32>, vector<8x32xf32> -> vector<8x32xf32>
    %c3_75 = arith.constant 3 : index
    %c0_76 = arith.constant 0 : index
    %c0_77 = arith.constant 0 : index
    %99 = vector.load %arg5[%c3_75, %c0_76, %c0_77] : memref<8x32x32xf32, #tpu.memory_space<vmem>>, vector<1x32x32xf32>
    %100 = vector.shape_cast %99 : vector<1x32x32xf32> to vector<32x32xf32>
    %cst_78 = arith.constant dense<0.000000e+00> : vector<8x32xf32>
    %101 = tpu.matmul %98, %100, %cst_78 {dimension_numbers = #tpu.dot_dimension_numbers<[1], [0], [0], [1], [0, 0, 1, 1], [], []>} : vector<8x32xf32>, vector<32x32xf32>, vector<8x32xf32> -> vector<8x32xf32>
    %102 = arith.addf %77, %101 : vector<8x32xf32>
    %c4 = arith.constant 4 : index
    %c0_79 = arith.constant 0 : index
    %c0_80 = arith.constant 0 : index
    %103 = vector.load %arg2[%c4, %c0_79, %c0_80] : memref<8x32x32xf32, #tpu.memory_space<vmem>>, vector<1x32x32xf32>
    %104 = vector.shape_cast %103 : vector<1x32x32xf32> to vector<32x32xf32>
    %cst_81 = arith.constant dense<0.000000e+00> : vector<8x32xf32>
    %105 = tpu.matmul %1, %104, %cst_81 {dimension_numbers = #tpu.dot_dimension_numbers<[1], [0], [0], [1], [0, 0, 1, 1], [], []>} : vector<8x32xf32>, vector<32x32xf32>, vector<8x32xf32> -> vector<8x32xf32>
    %c4_82 = arith.constant 4 : index
    %c0_83 = arith.constant 0 : index
    %c0_84 = arith.constant 0 : index
    %106 = vector.load %arg3[%c4_82, %c0_83, %c0_84] : memref<8x32x32xf32, #tpu.memory_space<vmem>>, vector<1x32x32xf32>
    %107 = vector.shape_cast %106 : vector<1x32x32xf32> to vector<32x32xf32>
    %cst_85 = arith.constant dense<0.000000e+00> : vector<8x32xf32>
    %108 = tpu.matmul %1, %107, %cst_85 {dimension_numbers = #tpu.dot_dimension_numbers<[1], [0], [0], [1], [0, 0, 1, 1], [], []>} : vector<8x32xf32>, vector<32x32xf32>, vector<8x32xf32> -> vector<8x32xf32>
    %c4_86 = arith.constant 4 : index
    %c0_87 = arith.constant 0 : index
    %c0_88 = arith.constant 0 : index
    %109 = vector.load %arg4[%c4_86, %c0_87, %c0_88] : memref<8x32x32xf32, #tpu.memory_space<vmem>>, vector<1x32x32xf32>
    %110 = vector.shape_cast %109 : vector<1x32x32xf32> to vector<32x32xf32>
    %cst_89 = arith.constant dense<0.000000e+00> : vector<8x32xf32>
    %111 = tpu.matmul %1, %110, %cst_89 {dimension_numbers = #tpu.dot_dimension_numbers<[1], [0], [0], [1], [0, 0, 1, 1], [], []>} : vector<8x32xf32>, vector<32x32xf32>, vector<8x32xf32> -> vector<8x32xf32>
    %cst_90 = arith.constant dense<0.000000e+00> : vector<8x8xf32>
    %112 = tpu.matmul %105, %108, %cst_90 {dimension_numbers = #tpu.dot_dimension_numbers<[1], [1], [0], [0], [0, 0, 1, 0], [], []>} : vector<8x32xf32>, vector<8x32xf32>, vector<8x8xf32> -> vector<8x8xf32>
    %cst_91 = arith.constant dense<0xFF800000> : vector<8xf32>
    %113 = vector.multi_reduction <maximumf>, %112, %cst_91 [1] : vector<8x8xf32> to vector<8xf32>
    %114 = vector.shape_cast %113 : vector<8xf32> to vector<8x1xf32>
    %115 = vector.broadcast %114 : vector<8x1xf32> to vector<8x8xf32>
    %116 = arith.subf %112, %115 : vector<8x8xf32>
    %117 = math.exp %116 : vector<8x8xf32>
    %cst_92 = arith.constant dense<0.000000e+00> : vector<8xf32>
    %118 = vector.multi_reduction <add>, %117, %cst_92 [1] : vector<8x8xf32> to vector<8xf32>
    %119 = vector.shape_cast %118 : vector<8xf32> to vector<8x1xf32>
    %120 = tpu.reciprocal %119 {approx = true} : vector<8x1xf32> -> vector<8x1xf32>
    %121 = vector.broadcast %120 : vector<8x1xf32> to vector<8x8xf32>
    %122 = arith.mulf %117, %121 : vector<8x8xf32>
    %cst_93 = arith.constant dense<0.000000e+00> : vector<8x32xf32>
    %123 = tpu.matmul %122, %111, %cst_93 {dimension_numbers = #tpu.dot_dimension_numbers<[1], [0], [0], [1], [0, 0, 1, 1], [], []>} : vector<8x8xf32>, vector<8x32xf32>, vector<8x32xf32> -> vector<8x32xf32>
    %c4_94 = arith.constant 4 : index
    %c0_95 = arith.constant 0 : index
    %c0_96 = arith.constant 0 : index
    %124 = vector.load %arg5[%c4_94, %c0_95, %c0_96] : memref<8x32x32xf32, #tpu.memory_space<vmem>>, vector<1x32x32xf32>
    %125 = vector.shape_cast %124 : vector<1x32x32xf32> to vector<32x32xf32>
    %cst_97 = arith.constant dense<0.000000e+00> : vector<8x32xf32>
    %126 = tpu.matmul %123, %125, %cst_97 {dimension_numbers = #tpu.dot_dimension_numbers<[1], [0], [0], [1], [0, 0, 1, 1], [], []>} : vector<8x32xf32>, vector<32x32xf32>, vector<8x32xf32> -> vector<8x32xf32>
    %127 = arith.addf %102, %126 : vector<8x32xf32>
    %c5 = arith.constant 5 : index
    %c0_98 = arith.constant 0 : index
    %c0_99 = arith.constant 0 : index
    %128 = vector.load %arg2[%c5, %c0_98, %c0_99] : memref<8x32x32xf32, #tpu.memory_space<vmem>>, vector<1x32x32xf32>
    %129 = vector.shape_cast %128 : vector<1x32x32xf32> to vector<32x32xf32>
    %cst_100 = arith.constant dense<0.000000e+00> : vector<8x32xf32>
    %130 = tpu.matmul %1, %129, %cst_100 {dimension_numbers = #tpu.dot_dimension_numbers<[1], [0], [0], [1], [0, 0, 1, 1], [], []>} : vector<8x32xf32>, vector<32x32xf32>, vector<8x32xf32> -> vector<8x32xf32>
    %c5_101 = arith.constant 5 : index
    %c0_102 = arith.constant 0 : index
    %c0_103 = arith.constant 0 : index
    %131 = vector.load %arg3[%c5_101, %c0_102, %c0_103] : memref<8x32x32xf32, #tpu.memory_space<vmem>>, vector<1x32x32xf32>
    %132 = vector.shape_cast %131 : vector<1x32x32xf32> to vector<32x32xf32>
    %cst_104 = arith.constant dense<0.000000e+00> : vector<8x32xf32>
    %133 = tpu.matmul %1, %132, %cst_104 {dimension_numbers = #tpu.dot_dimension_numbers<[1], [0], [0], [1], [0, 0, 1, 1], [], []>} : vector<8x32xf32>, vector<32x32xf32>, vector<8x32xf32> -> vector<8x32xf32>
    %c5_105 = arith.constant 5 : index
    %c0_106 = arith.constant 0 : index
    %c0_107 = arith.constant 0 : index
    %134 = vector.load %arg4[%c5_105, %c0_106, %c0_107] : memref<8x32x32xf32, #tpu.memory_space<vmem>>, vector<1x32x32xf32>
    %135 = vector.shape_cast %134 : vector<1x32x32xf32> to vector<32x32xf32>
    %cst_108 = arith.constant dense<0.000000e+00> : vector<8x32xf32>
    %136 = tpu.matmul %1, %135, %cst_108 {dimension_numbers = #tpu.dot_dimension_numbers<[1], [0], [0], [1], [0, 0, 1, 1], [], []>} : vector<8x32xf32>, vector<32x32xf32>, vector<8x32xf32> -> vector<8x32xf32>
    %cst_109 = arith.constant dense<0.000000e+00> : vector<8x8xf32>
    %137 = tpu.matmul %130, %133, %cst_109 {dimension_numbers = #tpu.dot_dimension_numbers<[1], [1], [0], [0], [0, 0, 1, 0], [], []>} : vector<8x32xf32>, vector<8x32xf32>, vector<8x8xf32> -> vector<8x8xf32>
    %cst_110 = arith.constant dense<0xFF800000> : vector<8xf32>
    %138 = vector.multi_reduction <maximumf>, %137, %cst_110 [1] : vector<8x8xf32> to vector<8xf32>
    %139 = vector.shape_cast %138 : vector<8xf32> to vector<8x1xf32>
    %140 = vector.broadcast %139 : vector<8x1xf32> to vector<8x8xf32>
    %141 = arith.subf %137, %140 : vector<8x8xf32>
    %142 = math.exp %141 : vector<8x8xf32>
    %cst_111 = arith.constant dense<0.000000e+00> : vector<8xf32>
    %143 = vector.multi_reduction <add>, %142, %cst_111 [1] : vector<8x8xf32> to vector<8xf32>
    %144 = vector.shape_cast %143 : vector<8xf32> to vector<8x1xf32>
    %145 = tpu.reciprocal %144 {approx = true} : vector<8x1xf32> -> vector<8x1xf32>
    %146 = vector.broadcast %145 : vector<8x1xf32> to vector<8x8xf32>
    %147 = arith.mulf %142, %146 : vector<8x8xf32>
    %cst_112 = arith.constant dense<0.000000e+00> : vector<8x32xf32>
    %148 = tpu.matmul %147, %136, %cst_112 {dimension_numbers = #tpu.dot_dimension_numbers<[1], [0], [0], [1], [0, 0, 1, 1], [], []>} : vector<8x8xf32>, vector<8x32xf32>, vector<8x32xf32> -> vector<8x32xf32>
    %c5_113 = arith.constant 5 : index
    %c0_114 = arith.constant 0 : index
    %c0_115 = arith.constant 0 : index
    %149 = vector.load %arg5[%c5_113, %c0_114, %c0_115] : memref<8x32x32xf32, #tpu.memory_space<vmem>>, vector<1x32x32xf32>
    %150 = vector.shape_cast %149 : vector<1x32x32xf32> to vector<32x32xf32>
    %cst_116 = arith.constant dense<0.000000e+00> : vector<8x32xf32>
    %151 = tpu.matmul %148, %150, %cst_116 {dimension_numbers = #tpu.dot_dimension_numbers<[1], [0], [0], [1], [0, 0, 1, 1], [], []>} : vector<8x32xf32>, vector<32x32xf32>, vector<8x32xf32> -> vector<8x32xf32>
    %152 = arith.addf %127, %151 : vector<8x32xf32>
    %c6 = arith.constant 6 : index
    %c0_117 = arith.constant 0 : index
    %c0_118 = arith.constant 0 : index
    %153 = vector.load %arg2[%c6, %c0_117, %c0_118] : memref<8x32x32xf32, #tpu.memory_space<vmem>>, vector<1x32x32xf32>
    %154 = vector.shape_cast %153 : vector<1x32x32xf32> to vector<32x32xf32>
    %cst_119 = arith.constant dense<0.000000e+00> : vector<8x32xf32>
    %155 = tpu.matmul %1, %154, %cst_119 {dimension_numbers = #tpu.dot_dimension_numbers<[1], [0], [0], [1], [0, 0, 1, 1], [], []>} : vector<8x32xf32>, vector<32x32xf32>, vector<8x32xf32> -> vector<8x32xf32>
    %c6_120 = arith.constant 6 : index
    %c0_121 = arith.constant 0 : index
    %c0_122 = arith.constant 0 : index
    %156 = vector.load %arg3[%c6_120, %c0_121, %c0_122] : memref<8x32x32xf32, #tpu.memory_space<vmem>>, vector<1x32x32xf32>
    %157 = vector.shape_cast %156 : vector<1x32x32xf32> to vector<32x32xf32>
    %cst_123 = arith.constant dense<0.000000e+00> : vector<8x32xf32>
    %158 = tpu.matmul %1, %157, %cst_123 {dimension_numbers = #tpu.dot_dimension_numbers<[1], [0], [0], [1], [0, 0, 1, 1], [], []>} : vector<8x32xf32>, vector<32x32xf32>, vector<8x32xf32> -> vector<8x32xf32>
    %c6_124 = arith.constant 6 : index
    %c0_125 = arith.constant 0 : index
    %c0_126 = arith.constant 0 : index
    %159 = vector.load %arg4[%c6_124, %c0_125, %c0_126] : memref<8x32x32xf32, #tpu.memory_space<vmem>>, vector<1x32x32xf32>
    %160 = vector.shape_cast %159 : vector<1x32x32xf32> to vector<32x32xf32>
    %cst_127 = arith.constant dense<0.000000e+00> : vector<8x32xf32>
    %161 = tpu.matmul %1, %160, %cst_127 {dimension_numbers = #tpu.dot_dimension_numbers<[1], [0], [0], [1], [0, 0, 1, 1], [], []>} : vector<8x32xf32>, vector<32x32xf32>, vector<8x32xf32> -> vector<8x32xf32>
    %cst_128 = arith.constant dense<0.000000e+00> : vector<8x8xf32>
    %162 = tpu.matmul %155, %158, %cst_128 {dimension_numbers = #tpu.dot_dimension_numbers<[1], [1], [0], [0], [0, 0, 1, 0], [], []>} : vector<8x32xf32>, vector<8x32xf32>, vector<8x8xf32> -> vector<8x8xf32>
    %cst_129 = arith.constant dense<0xFF800000> : vector<8xf32>
    %163 = vector.multi_reduction <maximumf>, %162, %cst_129 [1] : vector<8x8xf32> to vector<8xf32>
    %164 = vector.shape_cast %163 : vector<8xf32> to vector<8x1xf32>
    %165 = vector.broadcast %164 : vector<8x1xf32> to vector<8x8xf32>
    %166 = arith.subf %162, %165 : vector<8x8xf32>
    %167 = math.exp %166 : vector<8x8xf32>
    %cst_130 = arith.constant dense<0.000000e+00> : vector<8xf32>
    %168 = vector.multi_reduction <add>, %167, %cst_130 [1] : vector<8x8xf32> to vector<8xf32>
    %169 = vector.shape_cast %168 : vector<8xf32> to vector<8x1xf32>
    %170 = tpu.reciprocal %169 {approx = true} : vector<8x1xf32> -> vector<8x1xf32>
    %171 = vector.broadcast %170 : vector<8x1xf32> to vector<8x8xf32>
    %172 = arith.mulf %167, %171 : vector<8x8xf32>
    %cst_131 = arith.constant dense<0.000000e+00> : vector<8x32xf32>
    %173 = tpu.matmul %172, %161, %cst_131 {dimension_numbers = #tpu.dot_dimension_numbers<[1], [0], [0], [1], [0, 0, 1, 1], [], []>} : vector<8x8xf32>, vector<8x32xf32>, vector<8x32xf32> -> vector<8x32xf32>
    %c6_132 = arith.constant 6 : index
    %c0_133 = arith.constant 0 : index
    %c0_134 = arith.constant 0 : index
    %174 = vector.load %arg5[%c6_132, %c0_133, %c0_134] : memref<8x32x32xf32, #tpu.memory_space<vmem>>, vector<1x32x32xf32>
    %175 = vector.shape_cast %174 : vector<1x32x32xf32> to vector<32x32xf32>
    %cst_135 = arith.constant dense<0.000000e+00> : vector<8x32xf32>
    %176 = tpu.matmul %173, %175, %cst_135 {dimension_numbers = #tpu.dot_dimension_numbers<[1], [0], [0], [1], [0, 0, 1, 1], [], []>} : vector<8x32xf32>, vector<32x32xf32>, vector<8x32xf32> -> vector<8x32xf32>
    %177 = arith.addf %152, %176 : vector<8x32xf32>
    %c7 = arith.constant 7 : index
    %c0_136 = arith.constant 0 : index
    %c0_137 = arith.constant 0 : index
    %178 = vector.load %arg2[%c7, %c0_136, %c0_137] : memref<8x32x32xf32, #tpu.memory_space<vmem>>, vector<1x32x32xf32>
    %179 = vector.shape_cast %178 : vector<1x32x32xf32> to vector<32x32xf32>
    %cst_138 = arith.constant dense<0.000000e+00> : vector<8x32xf32>
    %180 = tpu.matmul %1, %179, %cst_138 {dimension_numbers = #tpu.dot_dimension_numbers<[1], [0], [0], [1], [0, 0, 1, 1], [], []>} : vector<8x32xf32>, vector<32x32xf32>, vector<8x32xf32> -> vector<8x32xf32>
    %c7_139 = arith.constant 7 : index
    %c0_140 = arith.constant 0 : index
    %c0_141 = arith.constant 0 : index
    %181 = vector.load %arg3[%c7_139, %c0_140, %c0_141] : memref<8x32x32xf32, #tpu.memory_space<vmem>>, vector<1x32x32xf32>
    %182 = vector.shape_cast %181 : vector<1x32x32xf32> to vector<32x32xf32>
    %cst_142 = arith.constant dense<0.000000e+00> : vector<8x32xf32>
    %183 = tpu.matmul %1, %182, %cst_142 {dimension_numbers = #tpu.dot_dimension_numbers<[1], [0], [0], [1], [0, 0, 1, 1], [], []>} : vector<8x32xf32>, vector<32x32xf32>, vector<8x32xf32> -> vector<8x32xf32>
    %c7_143 = arith.constant 7 : index
    %c0_144 = arith.constant 0 : index
    %c0_145 = arith.constant 0 : index
    %184 = vector.load %arg4[%c7_143, %c0_144, %c0_145] : memref<8x32x32xf32, #tpu.memory_space<vmem>>, vector<1x32x32xf32>
    %185 = vector.shape_cast %184 : vector<1x32x32xf32> to vector<32x32xf32>
    %cst_146 = arith.constant dense<0.000000e+00> : vector<8x32xf32>
    %186 = tpu.matmul %1, %185, %cst_146 {dimension_numbers = #tpu.dot_dimension_numbers<[1], [0], [0], [1], [0, 0, 1, 1], [], []>} : vector<8x32xf32>, vector<32x32xf32>, vector<8x32xf32> -> vector<8x32xf32>
    %cst_147 = arith.constant dense<0.000000e+00> : vector<8x8xf32>
    %187 = tpu.matmul %180, %183, %cst_147 {dimension_numbers = #tpu.dot_dimension_numbers<[1], [1], [0], [0], [0, 0, 1, 0], [], []>} : vector<8x32xf32>, vector<8x32xf32>, vector<8x8xf32> -> vector<8x8xf32>
    %cst_148 = arith.constant dense<0xFF800000> : vector<8xf32>
    %188 = vector.multi_reduction <maximumf>, %187, %cst_148 [1] : vector<8x8xf32> to vector<8xf32>
    %189 = vector.shape_cast %188 : vector<8xf32> to vector<8x1xf32>
    %190 = vector.broadcast %189 : vector<8x1xf32> to vector<8x8xf32>
    %191 = arith.subf %187, %190 : vector<8x8xf32>
    %192 = math.exp %191 : vector<8x8xf32>
    %cst_149 = arith.constant dense<0.000000e+00> : vector<8xf32>
    %193 = vector.multi_reduction <add>, %192, %cst_149 [1] : vector<8x8xf32> to vector<8xf32>
    %194 = vector.shape_cast %193 : vector<8xf32> to vector<8x1xf32>
    %195 = tpu.reciprocal %194 {approx = true} : vector<8x1xf32> -> vector<8x1xf32>
    %196 = vector.broadcast %195 : vector<8x1xf32> to vector<8x8xf32>
    %197 = arith.mulf %192, %196 : vector<8x8xf32>
    %cst_150 = arith.constant dense<0.000000e+00> : vector<8x32xf32>
    %198 = tpu.matmul %197, %186, %cst_150 {dimension_numbers = #tpu.dot_dimension_numbers<[1], [0], [0], [1], [0, 0, 1, 1], [], []>} : vector<8x8xf32>, vector<8x32xf32>, vector<8x32xf32> -> vector<8x32xf32>
    %c7_151 = arith.constant 7 : index
    %c0_152 = arith.constant 0 : index
    %c0_153 = arith.constant 0 : index
    %199 = vector.load %arg5[%c7_151, %c0_152, %c0_153] : memref<8x32x32xf32, #tpu.memory_space<vmem>>, vector<1x32x32xf32>
    %200 = vector.shape_cast %199 : vector<1x32x32xf32> to vector<32x32xf32>
    %cst_154 = arith.constant dense<0.000000e+00> : vector<8x32xf32>
    %201 = tpu.matmul %198, %200, %cst_154 {dimension_numbers = #tpu.dot_dimension_numbers<[1], [0], [0], [1], [0, 0, 1, 1], [], []>} : vector<8x32xf32>, vector<32x32xf32>, vector<8x32xf32> -> vector<8x32xf32>
    %202 = arith.addf %177, %201 : vector<8x32xf32>
    %c0_155 = arith.constant 0 : index
    %c0_156 = arith.constant 0 : index
    %203 = vector.load %arg6[%c0_155, %c0_156] : memref<1x32xf32, #tpu.memory_space<vmem>>, vector<1x32xf32>
    %204 = vector.broadcast %203 : vector<1x32xf32> to vector<8x32xf32>
    %205 = arith.addf %202, %204 : vector<8x32xf32>
    %c0_157 = arith.constant 0 : index
    %c0_158 = arith.constant 0 : index
    %c0_159 = arith.constant 0 : index
    %206 = vector.load %arg7[%c0_157, %c0_158, %c0_159] : memref<1x8x32xf32, #tpu.memory_space<vmem>>, vector<1x8x32xf32>
    %207 = vector.shape_cast %206 : vector<1x8x32xf32> to vector<8x32xf32>
    %208 = vector.shape_cast %205 : vector<8x32xf32> to vector<1x8x32xf32>
    tpu.vector_store %arg7[%c0_157, %c0_158, %c0_159], %208 {strides = array<i32>} : memref<1x8x32xf32, #tpu.memory_space<vmem>>, vector<1x8x32xf32>,
    return
  }
  func.func @transform_0(%arg0: i32) -> (i32, i32, i32) {
    %c0_i32 = arith.constant 0 : i32
    %c0_i32_0 = arith.constant 0 : i32
    %c0_i32_1 = arith.constant 0 : i32
    return %arg0, %c0_i32, %c0_i32_0 : i32, i32, i32
  }
  func.func @transform_1(%arg0: i32) -> (i32, i32, i32) {
    %c0_i32 = arith.constant 0 : i32
    %c0_i32_0 = arith.constant 0 : i32
    %c0_i32_1 = arith.constant 0 : i32
    %c0_i32_2 = arith.constant 0 : i32
    return %c0_i32, %c0_i32_0, %c0_i32_1 : i32, i32, i32
  }
  func.func @transform_2(%arg0: i32) -> (i32, i32, i32) {
    %c0_i32 = arith.constant 0 : i32
    %c0_i32_0 = arith.constant 0 : i32
    %c0_i32_1 = arith.constant 0 : i32
    %c0_i32_2 = arith.constant 0 : i32
    return %c0_i32, %c0_i32_0, %c0_i32_1 : i32, i32, i32
  }
  func.func @transform_3(%arg0: i32) -> (i32, i32, i32) {
    %c0_i32 = arith.constant 0 : i32
    %c0_i32_0 = arith.constant 0 : i32
    %c0_i32_1 = arith.constant 0 : i32
    %c0_i32_2 = arith.constant 0 : i32
    return %c0_i32, %c0_i32_0, %c0_i32_1 : i32, i32, i32
  }
  func.func @transform_4(%arg0: i32) -> (i32, i32, i32) {
    %c0_i32 = arith.constant 0 : i32
    %c0_i32_0 = arith.constant 0 : i32
    %c0_i32_1 = arith.constant 0 : i32
    %c0_i32_2 = arith.constant 0 : i32
    return %c0_i32, %c0_i32_0, %c0_i32_1 : i32, i32, i32
  }
  func.func @transform_5(%arg0: i32) -> (i32, i32) {
    %c0_i32 = arith.constant 0 : i32
    %c0_i32_0 = arith.constant 0 : i32
    %c0_i32_1 = arith.constant 0 : i32
    return %c0_i32, %c0_i32_0 : i32, i32
  }
  func.func @transform_6(%arg0: i32) -> (i32, i32, i32) {
    %c0_i32 = arith.constant 0 : i32
    %c0_i32_0 = arith.constant 0 : i32
    %c0_i32_1 = arith.constant 0 : i32
    return %arg0, %c0_i32, %c0_i32_0 : i32, i32, i32
  }
}

</mosaic_0001>

<bundles_post_ra>
// kernel: self_attention_forward.1
= control target key start
LH: loop header
LB: loop body
LE: loop exit
PB: predicated region body
PF: predicated region fallthrough
CT: control target
= control target key end

     0   :  { %s5832_s0 = inlined_call_operand.hbm [shape: f32[2,8,32], index: 0, kind: input, shape index: {}]   ;;  %s5833_s1 = inlined_call_operand.hbm [shape: f32[8,32,32], index: 1, kind: input, shape index: {}]   ;;  %s5834_s2 = inlined_call_operand.hbm [shape: f32[8,32,32], index: 2, kind: input, shape index: {}]   ;;  %s5835_s3 = inlined_call_operand.hbm [shape: f32[8,32,32], index: 3, kind: input, shape index: {}]   ;;  %s5836_s4 = inlined_call_operand.hbm [shape: f32[8,32,32], index: 4, kind: input, shape index: {}]   ;;  %s5837_s5 = inlined_call_operand.vmem [shape: f32[1,32], index: 5, kind: input, shape index: {}]   ;;  %s5838_s6 = inlined_call_operand.hbm [shape: f32[2,8,32], index: 6, kind: output, shape index: {}]  }
   0x1   :  { %5843 = sst [smem:[#allocation16_spill]] %s5833_s1 }
   0x2   :  { %11 = vsyncpa [#allocation3], 0 }
   0x3   :  { %13 = vsyncpa [#allocation3 + $0x1], 0 }
   0x4   :  { %14 = vsyncpa [#allocation6], 0 }
   0x5   :  { %15 = vsyncpa [#allocation9], 0 }
   0x6   :  { %16 = vsyncpa [#allocation4], 0 }
   0x7   :  { %18 = vsyncpa [#allocation4 + $0x1], 0  ;;  %s5244_s21 = smov 0   ;;  %s5246_s22 = smov 0  }
   0x8   :  { %s5248_s23 = smov 0   ;;  %s5250_s24 = smov 0  }
   0x9 LB: > { %s5199_s25 = smov [#allocation5]   ;;  %s5265_s27 = sadd.s32 4294967295, %s5197_s24   ;;  %s5197_s24 = sphi %s5250_s24, %s5864_s24   ;;  %s5193_s23 = sphi %s5248_s23, %s5863_s23   ;;  %s5189_s22 = sphi %s5246_s22, %s5862_s22   ;;  %s5185_s21 = sphi %s5244_s21, %s5861_s21  }
   0xa   : > { %s198_s26 = sshll.u32 %s5199_s25, 4  ;;  %p4169_p0 = scmp.ge.s32.totalorder %s5197_s24, 1  ;;  %s199_s26 = int_to_ptr.vmem [resolvable:$true] %s198_s26 }
   0xb   : > { %p5839_p1 = scmp.eq.s32.totalorder %s5265_s27, 0  ;;  %p186_p2 = scmp.lt.s32.totalorder %s5197_s24, 3 }
   0xc   : > { %s5200_s29 = smov [#allocation8]   ;;  %s5201_s8 = smov [#allocation7]  }
   0xd   : > { %p5270_p3 = pnand %p4169_p0, %p186_p2  ;;  %s224_s30 = sshll.u32 %s5200_s29, 4  ;;  %s5283_s30 = int_to_ptr.vmem [resolvable:$true] %s224_s30 }
   0xe   : > { %s211_s9 = sshll.u32 %s5201_s8, 4  ;;  %s5004_s10 = scalar_lea.vmem %s199_s26, 4096  ;;  %s5285_s9 = int_to_ptr.vmem [resolvable:$true] %s211_s9 }
   0xf   : > { %s5844_s28 = scalar_select %p5270_p3, 1, 0 }
  0x10   : > { %p4889_p5 = pneg %p5270_p3  ;;  %p5005_p8 = scmp.ne.s32.totalorder %s199_s26, %s5004_s10 }
  0x11   : > { %p5012_p11 = scmp.lt.s32.totalorder %s199_s26, %s199_s26  ;;  %p5013_p12 = scmp.lt.s32.totalorder %s5004_s10, %s5004_s10 }
  0x12   : > { %p5279_p6 = pnand %p4889_p5, %p5839_p1 }
  0x13   : > { %p5014_p13 = por %p5013_p12, %p5012_p11 }
  0x14   : > { %p4995_p7 = pneg %p5279_p6 }
  0x16   : > { %p5007_p9 = pnand %p5005_p8, %p4995_p7 }
  0x18   : > { %p5008_p10 = pneg %p5007_p9 }
  0x1a   : > { %p5015_p0 = pnand %p5014_p13, %p5008_p10 }
  0x1c   : > { %5018 = shalt.err (!%p5015_p0)
}
  0x1d   : > { %s5202_s11 = smov 128   ;;  %s5203_s12 = smov 8  }
  0x1e   : > { %s5846_s1 = sld [smem:[#allocation16_spill]]  ;;  %s5030_s15 = scalar_lea.vmem %s5283_s30, 4096 }
  0x1f   : > { %p5031_p2 = scmp.ne.s32.totalorder %s5283_s30, %s5030_s15  ;;  %p5038_p9 = scmp.lt.s32.totalorder %s5283_s30, %s5283_s30 }
  0x20   : > { %p5039_p10 = scmp.lt.s32.totalorder %s5030_s15, %s5030_s15 }
  0x21   : > { %p5033_p5 = pnand %p5031_p2, %p4995_p7 }
  0x22   : > { %p5040_p11 = por %p5039_p10, %p5038_p9 }
  0x23   : > { %p5034_p8 = pneg %p5033_p5 }
  0x24   : > { %4892 = dma.hbm_to_vmem [thread:$0]  (!%p5279_p6), %s5846_s1, 4096, %s199_s26, [#allocation6], %s5202_s11, %s5202_s11, %s5203_s12  }
  0x25   : > { %p5041_p12 = pnand %p5040_p11, %p5034_p8 }
  0x27   : > { %5044 = shalt.err (!%p5041_p12)
}
  0x28   : > { %4898 = dma.hbm_to_vmem [thread:$0]  (!%p5279_p6), %s5835_s3, 4096, %s5283_s30, [#allocation9], %s5202_s11, %s5202_s11, %s5203_s12  }
  0x29   : > { %s5056_s18 = scalar_lea.vmem %s5285_s9, 4096  ;;  %p5064_p5 = scmp.lt.s32.totalorder %s5285_s9, %s5285_s9 }
  0x2a   : > { %p5057_p13 = scmp.ne.s32.totalorder %s5285_s9, %s5056_s18  ;;  %p5065_p8 = scmp.lt.s32.totalorder %s5056_s18, %s5056_s18 }
  0x2c   : > { %p5059_p0 = pnand %p5057_p13, %p4995_p7  ;;  %p5066_p9 = por %p5065_p8, %p5064_p5 }
  0x2e   : > { %p5060_p2 = pneg %p5059_p0 }
  0x30   : > { %p5067_p10 = pnand %p5066_p9, %p5060_p2 }
  0x32   : > { %5070 = shalt.err (!%p5067_p10)
}
  0x33   : > { %4895 = dma.hbm_to_vmem [thread:$0]  (!%p5279_p6), %s5834_s2, 4096, %s5285_s9, [#allocation6], %s5202_s11, %s5202_s11, %s5203_s12  }
  0x34   : > { %s5204_s25 = smov [#allocation10]  }
  0x35   : > { %s237_s26 = sshll.u32 %s5204_s25, 4  ;;  %s238_s26 = int_to_ptr.vmem [resolvable:$true] %s237_s26 }
  0x36   : > { %s5082_s29 = scalar_lea.vmem %s238_s26, 4096  ;;  %p5090_p0 = scmp.lt.s32.totalorder %s238_s26, %s238_s26 }
  0x37   : > { %p5083_p11 = scmp.ne.s32.totalorder %s238_s26, %s5082_s29  ;;  %p5091_p2 = scmp.lt.s32.totalorder %s5082_s29, %s5082_s29 }
  0x39   : > { %p5085_p12 = pnand %p5083_p11, %p4995_p7  ;;  %p5092_p5 = por %p5091_p2, %p5090_p0 }
  0x3b   : > { %p5086_p13 = pneg %p5085_p12 }
  0x3d   : > { %p5093_p8 = pnand %p5092_p5, %p5086_p13 }
  0x3f   : > { %5096 = shalt.err (!%p5093_p8)
}
  0x40   : > { %4901 = dma.hbm_to_vmem [thread:$0]  (!%p5279_p6), %s5836_s4, 4096, %s238_s26, [#allocation9], %s5202_s11, %s5202_s11, %s5203_s12  }
  0x41   : > { %s4168_s7 = sadd.s32 4294967294, %s5197_s24   ;;  %s5345_s9 = sadd.s32 1, %s5197_s24  }
  0x42   : > { %s28_s10 = ssub.s32 %s5197_s24, %s5345_s9  ;;  %s31_s13 = sadd.s32 1, %s5193_s23 }
  0x43   : > { %p29_p7 = scmp.eq.s32.totalorder %s28_s10, 0  ;;  %p38_p9 = scmp.ne.s32.totalorder %s5193_s23, %s5189_s22 }
  0x44   : > { %p39_p10 = scmp.eq.s32.totalorder %s5197_s24, 0  ;;  %p44_p11 = scmp.ne.s32.totalorder %s5189_s22, %s5185_s21 }
  0x45   : > { %s5356_s14 = scalar_select %p29_p7, %s5193_s23, %s31_s13  }
  0x46   : > { %p5358_p12 = por %p39_p10, %p38_p9  ;;  %p5364_p6 = por %p5839_p1, %p44_p11 }
  0x47   : > { %p173_p13 = scmp.eq.s32.totalorder %s5265_s27, 1  ;;  %p179_p0 = scmp.eq.s32.totalorder %s4168_s7, 1 }
  0x48   : > { %s5848_s11 = scalar_select %p5364_p6, 1, 0 }
  0x49   : > { %p4914_p2 = scmp.lt.s32.totalorder %s5197_s24, 2  ;;  %s254_s12 = sand.u32 1, %s5193_s23  }
  0x4a   : > { %p5371_p5 = por %p173_p13, %p38_p9  ;;  %p5375_p8 = por %p179_p0, %p44_p11 }
  0x4b   : > { %s4175_s18 = sshll.u32 %s254_s12, 3  ;;  %s4176_s19 = sshll.u32 %s5197_s24, 7 }
  0x4c   : > { %s5849_s16 = scalar_select %p5371_p5, 1, 0 }
  0x4d   : > { %s5850_s17 = scalar_select %p5375_p8, 1, 0 }
  0x4e   : > { %s5383_s26 = scalar_lea.hbm %s5832_s0, %s4176_s19  ;;  %s258_s29 = scalar_lea.vmem [#allocation2], %s4175_s18 }
  0x4f   : > { %s265_s30 = sshll.u32 %s258_s29, 4  ;;  %p5387_p7 = pnand %p4914_p2, %p5358_p12  ;;  %s266_s30 = int_to_ptr.vmem [resolvable:$true] %s265_s30 }
  0x50   : > { %s255_s7 = scalar_lea.sflag [#allocation3], %s254_s12  ;;  %s5097_s10 = scalar_lea.hbm %s5383_s26, 128 }
  0x51   : > { %p5098_p9 = scmp.ne.s32.totalorder %s5383_s26, %s5097_s10  ;;  %p5099_p10 = pneg %p5387_p7 }
  0x52   : > { %s5102_s20 = scalar_lea.hbm %s5832_s0, 256  ;;  %p5103_p0 = scmp.lt.s32.totalorder %s5383_s26, %s5832_s0 }
  0x53   : > { %p5100_p11 = pnand %p5099_p10, %p5098_p9  ;;  %p5104_p12 = scmp.lt.s32.totalorder %s5102_s20, %s5097_s10 }
  0x55   : > { %p5101_p13 = pneg %p5100_p11  ;;  %p5105_p2 = por %p5104_p12, %p5103_p0 }
  0x57   : > { %p5106_p4 = pnand %p5105_p2, %p5101_p13 }
  0x59   : > { %5109 = shalt.err (!%p5106_p4)
}
  0x5a   : > { %s5110_s15 = scalar_lea.vmem %s266_s30, 128  ;;  %s5205_s12 = smov [#allocation2]  }
  0x5b   : > { %p5111_p1 = scmp.ne.s32.totalorder %s266_s30, %s5110_s15  ;;  %s5115_s29 = sshll.u32 %s5205_s12, 4  ;;  %s5116_s29 = int_to_ptr.vmem [resolvable:$false] %s5115_s29 }
  0x5c   : > { %s5117_s1 = scalar_lea.vmem %s5116_s29, 256  ;;  %p5118_p9 = scmp.lt.s32.totalorder %s266_s30, %s5116_s29 }
  0x5d   : > { %p5113_p8 = pnand %p5111_p1, %p5099_p10  ;;  %p5119_p11 = scmp.lt.s32.totalorder %s5117_s1, %s5110_s15 }
  0x5f   : > { %p5114_p5 = pneg %p5113_p8  ;;  %p5120_p6 = por %p5119_p11, %p5118_p9 }
  0x61   : > { %p5121_p3 = pnand %p5120_p6, %p5114_p5 }
  0x63   : > { %5124 = shalt.err (!%p5121_p3)
}
  0x64   : > { %4905 = dma.hbm_to_vmem [thread:$0]  (!%p5387_p7), %s5383_s26, 128, %s266_s30, %s255_s7  }
  0x65   : > { %p5852_p13 = scmp.ne.s32.totalorder %s5844_s28, 0 }
  0x66   : > { %s5408_s10 = sand.u32 (!%p5852_p13), 1, %s5189_s22   ;;  %p5853_p1 = scmp.ne.s32.totalorder (!%p5852_p13), %s5848_s11, 0 }
  0x67   : > { %274 = sbr.rel (%p5852_p13) target bundleno = 7347 (0x1cb3), region = 44  ;;  %s4178_s13 = sshll.u32 (!%p5852_p13), %s5408_s10, 3 }
  0x68   : > { %s277_s19 = scalar_lea.sflag (!%p5852_p13), [#allocation3], %s5408_s10  ;;  %s5414_s1 = scalar_lea.vmem (!%p5852_p13), [#allocation2], %s4178_s13 }
  0x6c   : > { %5168 = dma.done.wait (%p5853_p1), %s277_s19, 128  }
  0x6d   : > { %5170 = vsyncadd (%p5853_p1), %s277_s19, 4294967168  ;;  %p5854_p3 = scmp.eq.s32.totalorder %s5265_s27, 0 }
  0x6f   : > { %5172 = dma.done.wait (%p5854_p3), [#allocation6], 8192   ;;  %p5855_p4 = pmov %p5854_p3 }
  0x70   : > { %p5856_p6 = pmov %p5854_p3 }
  0x71   : > { %5174 = vsyncadd (%p5855_p4), [#allocation6], 4294959104 }
  0x72   : > { %5176 = dma.done.wait (%p5856_p6), [#allocation9], 8192   ;;  %p5857_p5 = pmov %p5854_p3 }
  0x73   : > { %v5206_v0 = vmov 0.0   ;;  %vm5207_vm0 = vmmov 0   ;;  %v407_v1 = vld [vmem:[#allocation7 + $0x18] sm:$0xff]  ;;  %v406_v3 = vld [vmem:[#allocation7 + $0x10] sm:$0xff]  ;;  %v405_v5 = vld [vmem:[#allocation7 + $0x8] sm:$0xff]  ;;  %vm330_vm1 = vcmask 261120  }
  0x74   : > { %5178 = vsyncadd (%p5857_p5), [#allocation9], 4294959104  ;;  %4448 = vmatprep.subr.mxu1 %v5206_v0  ;;  %4437 = vmatprep.subr.mxu0 %v5206_v0  ;;  %v329_v2 = vld [vmem:[#allocation5 + $0x18] sm:$0xff]  ;;  %v328_v4 = vld [vmem:[#allocation5 + $0x10] sm:$0xff]  ;;  %vm628_vm2 = vcmask 64512   ;;  %s4242_s26 = sshll.u32 %s5265_s27, 7 }
  0x75   : > { %4456 = vmatprep.mubr.msk.f32.mxu1 %vm5207_vm0, %v5206_v0  ;;  %4445 = vmatprep.mubr.msk.f32.mxu0 %vm5207_vm0, %v5206_v0  ;;  %v327_v6 = vld [vmem:[#allocation5 + $0x8] sm:$0xff]  ;;  %v404_v7 = vld [vmem:[#allocation7] sm:$0xff]  ;;  %v5439_v9 = vld [vmem:[%s5414_s1] sm:$0xff]  ;;  %s324_s30 = scalar_lea.vmem [#allocation11], %s4178_s13  ;;  %s4058_s18 = scalar_lea.hbm %s5838_s6, %s4242_s26 }
  0x76   : > { %4449 = vmatpush3.msra.mxu1 %v407_v1  ;;  %4438 = vmatpush3.msra.mxu0 %v329_v2  ;;  %v326_v8 = vld [vmem:[#allocation5] sm:$0xff]  ;;  %v481_v14 = vld [vmem:[#allocation8 + $0x18] sm:$0xff]  ;;  %v480_v15 = vld [vmem:[#allocation8 + $0x10] sm:$0xff]  ;;  %s4060_s8 = sshll.u32 %s324_s30, 4  ;;  %s4047_s25 = scalar_lea.sflag [#allocation4], %s5408_s10  ;;  %s4061_s8 = int_to_ptr.vmem [resolvable:$true] %s4060_s8 }
  0x77   : > { %4450 = vmatprep.subr.mxu1 %v5206_v0  ;;  %4439 = vmatprep.subr.mxu0 %v5206_v0  ;;  %v479_v16 = vld [vmem:[#allocation8 + $0x8] sm:$0xff]  ;;  %v478_v17 = vld [vmem:[#allocation8] sm:$0xff]  ;;  %v721_v28 = vld [vmem:[#allocation5 + $0x38] sm:$0xff]  ;;  %s5125_s15 = scalar_lea.vmem %s4061_s8, 128  ;;  %p5858_p7 = scmp.ne.s32.totalorder %s5849_s16, 0 }
  0x78   : > { %4451 = vmatpush3.msra.mxu1 %v406_v3  ;;  %4440 = vmatpush3.msra.mxu0 %v328_v4  ;;  %v720_v29 = vld [vmem:[#allocation5 + $0x30] sm:$0xff]  ;;  %v719_v30 = vld [vmem:[#allocation5 + $0x28] sm:$0xff]  ;;  %v718_v31 = vld [vmem:[#allocation5 + $0x20] sm:$0xff]  ;;  %p5126_p8 = scmp.ne.s32.totalorder %s4061_s8, %s5125_s15  ;;  %s5208_s27 = smov [#allocation11]  }
  0x79   : > { %4452 = vmatprep.subr.mxu1 %v5206_v0  ;;  %4441 = vmatprep.subr.mxu0 %v5206_v0  ;;  %v796_v35 = vld [vmem:[#allocation7 + $0x38] sm:$0xff]  ;;  %v795_v36 = vld [vmem:[#allocation7 + $0x30] sm:$0xff]  ;;  %v794_v37 = vld [vmem:[#allocation7 + $0x28] sm:$0xff]  ;;  %s5129_s12 = sshll.u32 %s5208_s27, 4  ;;  %s5130_s12 = int_to_ptr.vmem [resolvable:$false] %s5129_s12 }
  0x7a   : > { %4453 = vmatpush3.msra.mxu1 %v405_v5  ;;  %4442 = vmatpush3.msra.mxu0 %v327_v6  ;;  %v793_v38 = vld [vmem:[#allocation7 + $0x20] sm:$0xff]  ;;  %v871_v45 = vld [vmem:[#allocation8 + $0x38] sm:$0xff]  ;;  %v870_v46 = vld [vmem:[#allocation8 + $0x30] sm:$0xff]  ;;  %p5127_p10 = pnand %p5126_p8, %p5858_p7  ;;  %s5131_s29 = scalar_lea.vmem %s5130_s12, 256 }
  0x7b   : > { %4454 = vmatprep.subr.mxu1 %v5206_v0  ;;  %4443 = vmatprep.subr.mxu0 %v5206_v0  ;;  %v869_v47 = vld [vmem:[#allocation8 + $0x28] sm:$0xff]  ;;  %v868_v48 = vld [vmem:[#allocation8 + $0x20] sm:$0xff]  ;;  %v1106_v59 = vld [vmem:[#allocation10 + $0x38] sm:$0xff]  ;;  %p5132_p12 = scmp.lt.s32.totalorder %s4061_s8, %s5130_s12  ;;  %p5133_p2 = scmp.lt.s32.totalorder %s5131_s29, %s5125_s15 }
  0x7c   : > { %4455 = vmatpush3.msra.mxu1 %v404_v7  ;;  %4444 = vmatpush3.msra.mxu0 %v326_v8  ;;  %v1105_v60 = vld [vmem:[#allocation10 + $0x30] sm:$0xff]  ;;  %v1104_v61 = vld [vmem:[#allocation10 + $0x28] sm:$0xff]  ;;  %v1103_v62 = vld [vmem:[#allocation10 + $0x20] sm:$0xff]  ;;  %p5128_p0 = pneg %p5127_p10 }
  0x7d   : > { %4457 = vmatmul.mubr.msk.f32.vlgmr.msra.gmra.mxu1 %vm330_vm1, %v5439_v9  ;;  %4446 = vmatmul.mubr.msk.f32.vlgmr.msra.gmra.mxu0 %vm330_vm1, %v5439_v9  ;;  %v716_v3 = vld [vmem:[#allocation10 + $0x18] sm:$0xff]  ;;  %v715_v4 = vld [vmem:[#allocation10 + $0x10] sm:$0xff]  ;;  %v714_v5 = vld [vmem:[#allocation10 + $0x8] sm:$0xff]  ;;  %p5134_p9 = por %p5133_p2, %p5132_p12 }
  0x7e   : > { %4470 = vmatprep.subr.mxu1 %v5206_v0  ;;  %4472 = vmatprep.mubr.msk.f32.mxu1 %vm5207_vm0, %v5206_v0  ;;  %v713_v6 = vld [vmem:[#allocation10] sm:$0xff]  ;;  %v1332_v7 = vld [vmem:[#allocation7 + $0x58] sm:$0xff]  ;;  %v1331_v8 = vld [vmem:[#allocation7 + $0x50] sm:$0xff] }
  0x7f   : > { %4459 = vmatprep.subr.mxu0 %v5206_v0  ;;  %4467 = vmatprep.mubr.msk.f32.mxu0 %vm5207_vm0, %v5206_v0  ;;  %p5135_p11 = pnand %p5134_p9, %p5128_p0 }
  0x80   : > { %4460 = vmatpush3.msra.mxu0 %v481_v14  ;;  %v1256_v14 = vld [vmem:[#allocation5 + $0x50] sm:$0xff] }
  0x81   : > { %4461 = vmatprep.subr.mxu0 %v5206_v0 }
  0x82   : > { %4462 = vmatpush3.msra.mxu0 %v480_v15 }
  0x83   : > { %4463 = vmatprep.subr.mxu0 %v5206_v0 }
  0x84   : > { %4464 = vmatpush3.msra.mxu0 %v479_v16  ;;  %v1255_v16 = vld [vmem:[#allocation5 + $0x48] sm:$0xff] }
  0x85   : > { %4465 = vmatprep.subr.mxu0 %v5206_v0 }
  0x86   : > { %4466 = vmatpush3.msra.mxu0 %v478_v17  ;;  %v1254_v17 = vld [vmem:[#allocation5 + $0x40] sm:$0xff] }
  0x87   : > { %4468 = vmatmul.mubr.msk.f32.vlgmr.msra.gmra.mxu0 %vm330_vm1, %v5439_v9  ;;  %4480 = vmatprep.subr.mxu0 %v5206_v0 }
  0x88   : > { %4488 = vmatprep.mubr.msk.f32.mxu0 %vm5207_vm0, %v5206_v0  ;;  %4481 = vmatpush3.msra.mxu0 %v721_v28  ;;  %v1405_v28 = vld [vmem:[#allocation8 + $0x48] sm:$0xff] }
  0x89   : > { %4482 = vmatprep.subr.mxu0 %v5206_v0 }
  0x8a   : > { %4483 = vmatpush3.msra.mxu0 %v720_v29  ;;  %v1404_v29 = vld [vmem:[#allocation8 + $0x40] sm:$0xff] }
  0x8b   : > { %4484 = vmatprep.subr.mxu0 %v5206_v0 }
  0x8c   : > { %4485 = vmatpush3.msra.mxu0 %v719_v30 }
  0x8d   : > { %4486 = vmatprep.subr.mxu0 %v5206_v0 }
  0x8e   : > { %4487 = vmatpush3.msra.mxu0 %v718_v31 }
  0x8f   : > { %4489 = vmatmul.mubr.msk.f32.vlgmr.msra.gmra.mxu0 %vm330_vm1, %v5439_v9  ;;  %4502 = vmatprep.subr.mxu0 %v5206_v0 }
  0x90   : > { %4510 = vmatprep.mubr.msk.f32.mxu0 %vm5207_vm0, %v5206_v0  ;;  %4503 = vmatpush3.msra.mxu0 %v871_v45 }
  0x91   : > { %4504 = vmatprep.subr.mxu0 %v5206_v0 }
  0x92   : > { %4505 = vmatpush3.msra.mxu0 %v870_v46 }
  0x93   : > { %4506 = vmatprep.subr.mxu0 %v5206_v0 }
  0x94   : > { %4507 = vmatpush3.msra.mxu0 %v869_v47  ;;  %v1721_v47 = vld [vmem:[#allocation5 + $0x78] sm:$0xff] }
  0x95   : > { %4508 = vmatprep.subr.mxu0 %v5206_v0 }
  0x96   : > { %4509 = vmatpush3.msra.mxu0 %v868_v48  ;;  %v1720_v48 = vld [vmem:[#allocation5 + $0x70] sm:$0xff] }
  0x97   : > { %4511 = vmatmul.mubr.msk.f32.vlgmr.msra.gmra.mxu0 %vm330_vm1, %v5439_v9  ;;  %4523 = vmatprep.subr.mxu0 %v5206_v0 }
  0x98   : > { %4531 = vmatprep.mubr.msk.f32.mxu0 %vm5207_vm0, %v5206_v0  ;;  %4524 = vmatpush3.msra.mxu0 %v1106_v59  ;;  %v1869_v59 = vld [vmem:[#allocation8 + $0x68] sm:$0xff] }
  0x99   : > { %4525 = vmatprep.subr.mxu0 %v5206_v0 }
  0x9a   : > { %4526 = vmatpush3.msra.mxu0 %v1105_v60  ;;  %v1868_v60 = vld [vmem:[#allocation8 + $0x60] sm:$0xff] }
  0x9b   : > { %4527 = vmatprep.subr.mxu0 %v5206_v0 }
  0x9c   : > { %4528 = vmatpush3.msra.mxu0 %v1104_v61 }
  0x9d   : > { %4529 = vmatprep.subr.mxu0 %v5206_v0 }
  0x9e   : > { %4530 = vmatpush3.msra.mxu0 %v1103_v62 }
  0x9f   : > { %4545 = vmatprep.subr.mxu0 %v5206_v0 }
 0x13d   : > { %v474_v10 = vpop.f32.mrf.mxu1  ;;  %v400_v11 = vpop.f32.mrf.mxu0 }
 0x13e   : > { %4471 = vmatpush3.xpose.msk.msra.mxu1 %vm330_vm1, %v474_v10  ;;  %v1330_v10 = vld [vmem:[#allocation7 + $0x48] sm:$0xff] }
 0x13f   : > { %v4458_v12 = vpop.f32.mrf.mxu1  ;;  %v4447_v13 = vpop.f32.mrf.mxu0  ;;  %4475 = vmatprep.subr.mxu1 %v5206_v0 }
 0x140   : > { %v1257_v12 = vld [vmem:[#allocation5 + $0x58] sm:$0xff] }
 0x141   : > { %4473 = vmatmul.mubr.msk.f32.vlgmr.msra.gmra.mxu1 %vm330_vm1, %v400_v11  ;;  %v1329_v11 = vld [vmem:[#allocation7 + $0x40] sm:$0xff] }
 0x142   : > { %4477 = vmatprep.mubr.msk.f32.mxu1 %vm5207_vm0, %v5206_v0 }
 0x147   : > { %v548_v26 = vpop.f32.mrf.mxu0 }
 0x148   : > { %4476 = vmatpush3.msra.mxu1 %v548_v26  ;;  %v1407_v26 = vld [vmem:[#allocation8 + $0x58] sm:$0xff] }
 0x149   : > { %v4469_v27 = vpop.f32.mrf.mxu0  ;;  %4491 = vmatprep.subr.mxu1 %v5206_v0 }
 0x14a   : > { %v1406_v27 = vld [vmem:[#allocation8 + $0x50] sm:$0xff] }
 0x14f   : > { %v788_v39 = vpop.f32.mrf.mxu0 }
 0x151   : > { %v4490_v40 = vpop.f32.mrf.mxu0 }
 0x152   : > { %v1642_v40 = vld [vmem:[#allocation10 + $0x58] sm:$0xff] }
 0x157   : > { %v938_v57 = vpop.f32.mrf.mxu0 }
 0x159   : > { %v4512_v58 = vpop.f32.mrf.mxu0 }
 0x15a   : > { %v1870_v58 = vld [vmem:[#allocation8 + $0x70] sm:$0xff] }
 0x201   : > { %v624_v18 = vpop.f32.mrf.mxu1 }
 0x202   : > { %v629_v19 = vsel %vm628_vm2, %v624_v18, -inf }
 0x203   : > { %630 = vmax.xlane.f32.xlu0 %v629_v19  ;;  %v4474_v20 = vpop.f32.mrf.mxu1 }
 0x28c   : > { %v631_v21 = vpop.xlane.xlu0 %630 }
 0x28d   : > { %v632_v22 = vsub.f32 %v624_v18, %v631_v21 }
 0x28f   : > { %v633_v23 = vmul.f32 1.442695, %v632_v22 }
 0x291   : > { %4960 = vpow2.f32 %v633_v23 }
 0x29e   : > { %v4961_v24 = vpop.eup %4960 }
 0x29f   : > { %v635_v25 = vsel %vm628_vm2, %v4961_v24, 0.0 }
 0x2a0   : > { %636 = vadd.xlane.f32.xlu0 %v635_v25 }
 0x329   : > { %v637_v32 = vpop.xlane.xlu0 %636 }
 0x32a   : > { %4962 = vrcp.f32 %v637_v32 }
 0x337   : > { %v4963_v33 = vpop.eup %4962 }
 0x338   : > { %v639_v34 = vmul.f32 %v4963_v33, %v4961_v24 }
 0x33a   : > { %4478 = vmatmul.mubr.msk.f32.vlgmr.msra.gmra.mxu1 %vm628_vm2, %v639_v34 }
 0x33b   : > { %4492 = vmatpush3.msra.mxu1 %v796_v35  ;;  %4499 = vmatprep.mubr.msk.f32.mxu1 %vm5207_vm0, %v5206_v0 }
 0x33c   : > { %4493 = vmatprep.subr.mxu1 %v5206_v0 }
 0x33d   : > { %4494 = vmatpush3.msra.mxu1 %v795_v36 }
 0x33e   : > { %4495 = vmatprep.subr.mxu1 %v5206_v0 }
 0x33f   : > { %4496 = vmatpush3.msra.mxu1 %v794_v37 }
 0x340   : > { %4497 = vmatprep.subr.mxu1 %v5206_v0 }
 0x341   : > { %4498 = vmatpush3.msra.mxu1 %v793_v38 }
 0x342   : > { %4500 = vmatmul.mubr.msk.f32.vlgmr.msra.gmra.mxu1 %vm330_vm1, %v5439_v9  ;;  %4513 = vmatprep.subr.mxu1 %v5206_v0 }
 0x343   : > { %4515 = vmatprep.mubr.msk.f32.mxu1 %vm5207_vm0, %v5206_v0 }
 0x3fa   : > { %v5488_v41 = vpop.f32.mrf.mxu1 }
 0x3fc   : > { %v4479_v42 = vpop.f32.mrf.mxu1 }
 0x3fd   : > { %v1640_v42 = vld [vmem:[#allocation10 + $0x48] sm:$0xff] }
 0x402   : > { %v863_v43 = vpop.f32.mrf.mxu1 }
 0x403   : > { %4514 = vmatpush3.xpose.msk.msra.mxu1 %vm330_vm1, %v863_v43  ;;  %v1639_v43 = vld [vmem:[#allocation10 + $0x40] sm:$0xff] }
 0x404   : > { %v4501_v44 = vpop.f32.mrf.mxu1  ;;  %4518 = vmatprep.subr.mxu1 %v5206_v0 }
 0x406   : > { %4516 = vmatmul.mubr.msk.f32.vlgmr.msra.gmra.mxu1 %vm330_vm1, %v788_v39 }
 0x407   : > { %4520 = vmatprep.mubr.msk.f32.mxu1 %vm5207_vm0, %v5206_v0  ;;  %4519 = vmatpush3.msra.mxu1 %v938_v57  ;;  %v1793_v57 = vld [vmem:[#allocation7 + $0x60] sm:$0xff] }
 0x408   : > { %4534 = vmatprep.subr.mxu1 %v5206_v0 }
 0x4c6   : > { %v1014_v49 = vpop.f32.mrf.mxu1 }
 0x4c7   : > { %v1018_v50 = vsel %vm628_vm2, %v1014_v49, -inf }
 0x4c8   : > { %1019 = vmax.xlane.f32.xlu1 %v1018_v50  ;;  %v4517_v51 = vpop.f32.mrf.mxu1  ;;  %v1718_v50 = vld [vmem:[#allocation5 + $0x60] sm:$0xff] }
 0x4c9   : > { %v1871_v51 = vld [vmem:[#allocation8 + $0x78] sm:$0xff] }
 0x551   : > { %v1020_v52 = vpop.xlane.xlu1 %1019 }
 0x552   : > { %v1021_v53 = vsub.f32 %v1014_v49, %v1020_v52  ;;  %v1719_v49 = vld [vmem:[#allocation5 + $0x68] sm:$0xff]  ;;  %v1796_v52 = vld [vmem:[#allocation7 + $0x78] sm:$0xff] }
 0x554   : > { %v1022_v54 = vmul.f32 1.442695, %v1021_v53 }
 0x556   : > { %4964 = vpow2.f32 %v1022_v54  ;;  %v1795_v54 = vld [vmem:[#allocation7 + $0x70] sm:$0xff] }
 0x563   : > { %v4965_v55 = vpop.eup %4964 }
 0x564   : > { %v1024_v56 = vsel %vm628_vm2, %v4965_v55, 0.0 }
 0x565   : > { %1025 = vadd.xlane.f32.xlu1 %v1024_v56  ;;  %v1794_v56 = vld [vmem:[#allocation7 + $0x68] sm:$0xff] }
 0x5ee   : > { %v1026_v63 = vpop.xlane.xlu1 %1025 }
 0x5ef   : > { %4966 = vrcp.f32 %v1026_v63 }
 0x5fc   : > { %v4967_v1 = vpop.eup %4966 }
 0x5fd   : > { %v1028_v2 = vmul.f32 %v4967_v1, %v4965_v55 }
 0x5ff   : > { %4521 = vmatmul.mubr.msk.f32.vlgmr.msra.gmra.mxu1 %vm628_vm2, %v1028_v2 }
 0x600   : > { %4535 = vmatpush3.msra.mxu1 %v716_v3  ;;  %4542 = vmatprep.mubr.msk.f32.mxu1 %vm5207_vm0, %v5206_v0 }
 0x601   : > { %4536 = vmatprep.subr.mxu1 %v5206_v0 }
 0x602   : > { %4537 = vmatpush3.msra.mxu1 %v715_v4 }
 0x603   : > { %4538 = vmatprep.subr.mxu1 %v5206_v0 }
 0x604   : > { %4539 = vmatpush3.msra.mxu1 %v714_v5 }
 0x605   : > { %4540 = vmatprep.subr.mxu1 %v5206_v0 }
 0x606   : > { %4541 = vmatpush3.msra.mxu1 %v713_v6 }
 0x607   : > { %4543 = vmatmul.mubr.msk.f32.vlgmr.msra.gmra.mxu1 %vm330_vm1, %v5488_v41  ;;  %4556 = vmatprep.subr.mxu1 %v5206_v0  ;;  %v1641_v41 = vld [vmem:[#allocation10 + $0x50] sm:$0xff] }
 0x608   : > { %4557 = vmatpush3.msra.mxu1 %v1332_v7  ;;  %4564 = vmatprep.mubr.msk.f32.mxu1 %vm5207_vm0, %v5206_v0 }
 0x609   : > { %4558 = vmatprep.subr.mxu1 %v5206_v0 }
 0x60a   : > { %4559 = vmatpush3.msra.mxu1 %v1331_v8 }
 0x60b   : > { %4560 = vmatprep.subr.mxu1 %v5206_v0 }
 0x60c   : > { %4561 = vmatpush3.msra.mxu1 %v1330_v10 }
 0x60d   : > { %4562 = vmatprep.subr.mxu1 %v5206_v0 }
 0x60e   : > { %4563 = vmatpush3.msra.mxu1 %v1329_v11 }
 0x60f   : > { %4565 = vmatmul.mubr.msk.f32.vlgmr.msra.gmra.mxu1 %vm330_vm1, %v5439_v9  ;;  %4578 = vmatprep.subr.mxu1 %v5206_v0 }
 0x610   : > { %4580 = vmatprep.mubr.msk.f32.mxu1 %vm5207_vm0, %v5206_v0 }
 0x6bf   : > { %v1098_v13 = vpop.f32.mrf.mxu1 }
 0x6c0   : > { %4532 = vmatmul.mubr.msk.f32.vlgmr.msra.gmra.mxu0 %vm330_vm1, %v1098_v13 }
 0x6c1   : > { %4546 = vmatpush3.msra.mxu0 %v1257_v12  ;;  %v4522_v15 = vpop.f32.mrf.mxu1  ;;  %4553 = vmatprep.mubr.msk.f32.mxu0 %vm5207_vm0, %v5206_v0 }
 0x6c2   : > { %4547 = vmatprep.subr.mxu0 %v5206_v0 }
 0x6c3   : > { %4548 = vmatpush3.msra.mxu0 %v1256_v14 }
 0x6c4   : > { %4549 = vmatprep.subr.mxu0 %v5206_v0 }
 0x6c5   : > { %4550 = vmatpush3.msra.mxu0 %v1255_v16 }
 0x6c6   : > { %4551 = vmatprep.subr.mxu0 %v5206_v0 }
 0x6c7   : > { %v5535_v18 = vpop.f32.mrf.mxu1  ;;  %4552 = vmatpush3.msra.mxu0 %v1254_v17  ;;  %v2106_v17 = vld [vmem:[#allocation10 + $0x78] sm:$0xff] }
 0x6c8   : > { %4554 = vmatmul.mubr.msk.f32.vlgmr.msra.gmra.mxu0 %vm330_vm1, %v5439_v9  ;;  %4567 = vmatprep.subr.mxu0 %v5206_v0 }
 0x6c9   : > { %v4544_v19 = vpop.f32.mrf.mxu1  ;;  %4575 = vmatprep.mubr.msk.f32.mxu0 %vm5207_vm0, %v5206_v0  ;;  %4568 = vmatpush3.msra.mxu0 %v1407_v26  ;;  %v2183_v26 = vld [vmem:[#allocation5 + $0x88] sm:$0xff] }
 0x6ca   : > { %4569 = vmatprep.subr.mxu0 %v5206_v0  ;;  %v2104_v19 = vld [vmem:[#allocation10 + $0x68] sm:$0xff] }
 0x6cb   : > { %4570 = vmatpush3.msra.mxu0 %v1406_v27  ;;  %v2182_v27 = vld [vmem:[#allocation5 + $0x80] sm:$0xff] }
 0x6cc   : > { %4571 = vmatprep.subr.mxu0 %v5206_v0 }
 0x6cd   : > { %4572 = vmatpush3.msra.mxu0 %v1405_v28  ;;  %v2260_v28 = vld [vmem:[#allocation7 + $0x98] sm:$0xff] }
 0x6ce   : > { %4573 = vmatprep.subr.mxu0 %v5206_v0 }
 0x6cf   : > { %v1399_v20 = vpop.f32.mrf.mxu1  ;;  %4574 = vmatpush3.msra.mxu0 %v1404_v29 }
 0x6d0   : > { %4579 = vmatpush3.xpose.msk.msra.mxu1 %vm330_vm1, %v1399_v20  ;;  %4576 = vmatmul.mubr.msk.f32.vlgmr.msra.gmra.mxu0 %vm330_vm1, %v5439_v9  ;;  %v2103_v20 = vld [vmem:[#allocation10 + $0x60] sm:$0xff] }
 0x6d1   : > { %v4566_v21 = vpop.f32.mrf.mxu1  ;;  %4583 = vmatprep.subr.mxu1 %v5206_v0  ;;  %4588 = vmatprep.subr.mxu0 %v5206_v0 }
 0x6d2   : > { %4596 = vmatprep.mubr.msk.f32.mxu0 %vm5207_vm0, %v5206_v0  ;;  %4589 = vmatpush3.msra.mxu0 %v1642_v40 }
 0x6d3   : > { %4590 = vmatprep.subr.mxu0 %v5206_v0 }
 0x6d4   : > { %4591 = vmatpush3.msra.mxu0 %v1641_v41  ;;  %v2335_v41 = vld [vmem:[#allocation8 + $0x98] sm:$0xff] }
 0x6d5   : > { %4592 = vmatprep.subr.mxu0 %v5206_v0 }
 0x6d6   : > { %4593 = vmatpush3.msra.mxu0 %v1640_v42  ;;  %v2334_v42 = vld [vmem:[#allocation8 + $0x90] sm:$0xff] }
 0x6d7   : > { %4594 = vmatprep.subr.mxu0 %v5206_v0 }
 0x6d8   : > { %4595 = vmatpush3.msra.mxu0 %v1639_v43  ;;  %v2333_v43 = vld [vmem:[#allocation8 + $0x88] sm:$0xff] }
 0x6d9   : > { %4610 = vmatprep.subr.mxu0 %v5206_v0 }
 0x780   : > { %v5544_v22 = vpop.f32.mrf.mxu0 }
 0x781   : > { %v1250_v63 = vadd.f32 %v5535_v18, %v5544_v22  ;;  %v2105_v18 = vld [vmem:[#allocation10 + $0x70] sm:$0xff] }
 0x782   : > { %v4533_v23 = vpop.f32.mrf.mxu0 }
 0x788   : > { %v1324_v24 = vpop.f32.mrf.mxu0 }
 0x789   : > { %4581 = vmatmul.mubr.msk.f32.vlgmr.msra.gmra.mxu1 %vm330_vm1, %v1324_v24  ;;  %v2185_v24 = vld [vmem:[#allocation5 + $0x98] sm:$0xff] }
 0x78a   : > { %v4555_v25 = vpop.f32.mrf.mxu0  ;;  %4585 = vmatprep.mubr.msk.f32.mxu1 %vm5207_vm0, %v5206_v0 }
 0x78b   : > { %v2184_v25 = vld [vmem:[#allocation5 + $0x90] sm:$0xff] }
 0x790   : > { %v1474_v38 = vpop.f32.mrf.mxu0 }
 0x791   : > { %4584 = vmatpush3.msra.mxu1 %v1474_v38 }
 0x792   : > { %v4577_v39 = vpop.f32.mrf.mxu0  ;;  %4599 = vmatprep.subr.mxu1 %v5206_v0 }
 0x849   : > { %v1550_v30 = vpop.f32.mrf.mxu1 }
 0x84a   : > { %v1554_v31 = vsel %vm628_vm2, %v1550_v30, -inf }
 0x84b   : > { %1555 = vmax.xlane.f32.xlu0 %v1554_v31  ;;  %v4582_v32 = vpop.f32.mrf.mxu1 }
 0x84c   : > { %v2258_v32 = vld [vmem:[#allocation7 + $0x88] sm:$0xff] }
 0x8d4   : > { %v1556_v33 = vpop.xlane.xlu0 %1555 }
 0x8d5   : > { %v1557_v34 = vsub.f32 %v1550_v30, %v1556_v33  ;;  %v2259_v30 = vld [vmem:[#allocation7 + $0x90] sm:$0xff]  ;;  %v2257_v33 = vld [vmem:[#allocation7 + $0x80] sm:$0xff] }
 0x8d7   : > { %v1558_v35 = vmul.f32 1.442695, %v1557_v34 }
 0x8d9   : > { %4968 = vpow2.f32 %v1558_v35 }
 0x8e6   : > { %v4969_v36 = vpop.eup %4968 }
 0x8e7   : > { %v1560_v37 = vsel %vm628_vm2, %v4969_v36, 0.0 }
 0x8e8   : > { %1561 = vadd.xlane.f32.xlu1 %v1560_v37 }
 0x971   : > { %v1562_v44 = vpop.xlane.xlu1 %1561 }
 0x972   : > { %4970 = vrcp.f32 %v1562_v44  ;;  %v2332_v44 = vld [vmem:[#allocation8 + $0x80] sm:$0xff] }
 0x97f   : > { %v4971_v45 = vpop.eup %4970 }
 0x980   : > { %v1564_v46 = vmul.f32 %v4971_v45, %v4969_v36 }
 0x982   : > { %4586 = vmatmul.mubr.msk.f32.vlgmr.msra.gmra.mxu1 %vm628_vm2, %v1564_v46 }
 0x983   : > { %4607 = vmatprep.mubr.msk.f32.mxu1 %vm5207_vm0, %v5206_v0  ;;  %4600 = vmatpush3.msra.mxu1 %v1721_v47 }
 0x984   : > { %4601 = vmatprep.subr.mxu1 %v5206_v0 }
 0x985   : > { %4602 = vmatpush3.msra.mxu1 %v1720_v48 }
 0x986   : > { %4603 = vmatprep.subr.mxu1 %v5206_v0 }
 0x987   : > { %4604 = vmatpush3.msra.mxu1 %v1719_v49 }
 0x988   : > { %4605 = vmatprep.subr.mxu1 %v5206_v0 }
 0x989   : > { %4606 = vmatpush3.msra.mxu1 %v1718_v50 }
 0x98a   : > { %4608 = vmatmul.mubr.msk.f32.vlgmr.msra.gmra.mxu1 %vm330_vm1, %v5439_v9  ;;  %4621 = vmatprep.subr.mxu1 %v5206_v0 }
 0x98b   : > { %4622 = vmatpush3.msra.mxu1 %v1871_v51  ;;  %4629 = vmatprep.mubr.msk.f32.mxu1 %vm5207_vm0, %v5206_v0 }
 0x98c   : > { %4623 = vmatprep.subr.mxu1 %v5206_v0 }
 0x98d   : > { %4624 = vmatpush3.msra.mxu1 %v1870_v58  ;;  %v2567_v58 = vld [vmem:[#allocation10 + $0x80] sm:$0xff] }
 0x98e   : > { %4625 = vmatprep.subr.mxu1 %v5206_v0 }
 0x98f   : > { %4626 = vmatpush3.msra.mxu1 %v1869_v59 }
 0x990   : > { %4627 = vmatprep.subr.mxu1 %v5206_v0 }
 0x991   : > { %4628 = vmatpush3.msra.mxu1 %v1868_v60 }
 0x992   : > { %4630 = vmatmul.mubr.msk.f32.vlgmr.msra.gmra.mxu1 %vm330_vm1, %v5439_v9  ;;  %4632 = vmatprep.subr.mxu1 %v5206_v0 }
 0x993   : > { %4634 = vmatprep.mubr.msk.f32.mxu1 %vm5207_vm0, %v5206_v0 }
 0xa42   : > { %v1634_v53 = vpop.f32.mrf.mxu1 }
 0xa43   : > { %4597 = vmatmul.mubr.msk.f32.vlgmr.msra.gmra.mxu0 %vm330_vm1, %v1634_v53 }
 0xa44   : > { %4611 = vmatpush3.msra.mxu0 %v1796_v52  ;;  %v4587_v55 = vpop.f32.mrf.mxu1  ;;  %4618 = vmatprep.mubr.msk.f32.mxu0 %vm5207_vm0, %v5206_v0 }
 0xa45   : > { %4612 = vmatprep.subr.mxu0 %v5206_v0  ;;  %v2570_v55 = vld [vmem:[#allocation10 + $0x98] sm:$0xff] }
 0xa46   : > { %4613 = vmatpush3.msra.mxu0 %v1795_v54 }
 0xa47   : > { %4614 = vmatprep.subr.mxu0 %v5206_v0 }
 0xa48   : > { %4615 = vmatpush3.msra.mxu0 %v1794_v56  ;;  %v2569_v56 = vld [vmem:[#allocation10 + $0x90] sm:$0xff] }
 0xa49   : > { %4616 = vmatprep.subr.mxu0 %v5206_v0 }
 0xa4a   : > { %4617 = vmatpush3.msra.mxu0 %v1793_v57  ;;  %v1788_v61 = vpop.f32.mrf.mxu1  ;;  %v2568_v57 = vld [vmem:[#allocation10 + $0x88] sm:$0xff] }
 0xa4b   : > { %4619 = vmatmul.mubr.msk.f32.vlgmr.msra.gmra.mxu0 %vm330_vm1, %v5439_v9  ;;  %4642 = vmatprep.subr.mxu0 %v5206_v0 }
 0xa4c   : > { %4650 = vmatprep.mubr.msk.f32.mxu0 %vm5207_vm0, %v5206_v0  ;;  %v4609_v62 = vpop.f32.mrf.mxu1  ;;  %4643 = vmatpush3.msra.mxu0 %v2106_v17  ;;  %v2799_v17 = vld [vmem:[#allocation8 + $0xb8] sm:$0xff] }
 0xa4d   : > { %4644 = vmatprep.subr.mxu0 %v5206_v0  ;;  %v2649_v62 = vld [vmem:[#allocation5 + $0xb8] sm:$0xff] }
 0xa4e   : > { %4645 = vmatpush3.msra.mxu0 %v2105_v18  ;;  %v2798_v18 = vld [vmem:[#allocation8 + $0xb0] sm:$0xff] }
 0xa4f   : > { %4646 = vmatprep.subr.mxu0 %v5206_v0 }
 0xa50   : > { %4647 = vmatpush3.msra.mxu0 %v2104_v19  ;;  %v2797_v19 = vld [vmem:[#allocation8 + $0xa8] sm:$0xff] }
 0xa51   : > { %4648 = vmatprep.subr.mxu0 %v5206_v0 }
 0xa52   : > { %v1938_v6 = vpop.f32.mrf.mxu1  ;;  %4649 = vmatpush3.msra.mxu0 %v2103_v20  ;;  %v2796_v20 = vld [vmem:[#allocation8 + $0xa0] sm:$0xff] }
 0xa53   : > { %4664 = vmatprep.subr.mxu0 %v5206_v0 }
 0xa54   : > { %v4631_v7 = vpop.f32.mrf.mxu1 }
 0xa55   : > { %v2722_v7 = vld [vmem:[#allocation7 + $0xa8] sm:$0xff] }
 0xb03   : > { %v1712_v1 = vpop.f32.mrf.mxu0 }
 0xb04   : > { %v5596_v2 = vadd.f32 %v1712_v1, %v1250_v63  ;;  %v2648_v63 = vld [vmem:[#allocation5 + $0xb0] sm:$0xff]  ;;  %v2647_v1 = vld [vmem:[#allocation5 + $0xa8] sm:$0xff] }
 0xb05   : > { %v4598_v3 = vpop.f32.mrf.mxu0 }
 0xb06   : > { %v2724_v3 = vld [vmem:[#allocation7 + $0xb8] sm:$0xff] }
 0xb0b   : > { %v1863_v4 = vpop.f32.mrf.mxu0 }
 0xb0c   : > { %4633 = vmatpush3.xpose.msk.msra.mxu1 %vm330_vm1, %v1863_v4 }
 0xb0d   : > { %v4620_v5 = vpop.f32.mrf.mxu0  ;;  %4637 = vmatprep.subr.mxu1 %v5206_v0 }
 0xb0e   : > { %v2723_v5 = vld [vmem:[#allocation7 + $0xb0] sm:$0xff] }
 0xb0f   : > { %4635 = vmatmul.mubr.msk.f32.vlgmr.msra.gmra.mxu1 %vm330_vm1, %v1788_v61 }
 0xb10   : > { %4639 = vmatprep.mubr.msk.f32.mxu1 %vm5207_vm0, %v5206_v0  ;;  %4638 = vmatpush3.msra.mxu1 %v1938_v6 }
 0xb11   : > { %4653 = vmatprep.subr.mxu1 %v5206_v0 }
 0xbcf   : > { %v2014_v8 = vpop.f32.mrf.mxu1 }
 0xbd0   : > { %v2018_v10 = vsel %vm628_vm2, %v2014_v8, -inf }
 0xbd1   : > { %2019 = vmax.xlane.f32.xlu0 %v2018_v10  ;;  %v4636_v11 = vpop.f32.mrf.mxu1 }
 0xc5a   : > { %v2020_v12 = vpop.xlane.xlu0 %2019 }
 0xc5b   : > { %v2021_v13 = vsub.f32 %v2014_v8, %v2020_v12  ;;  %v2721_v8 = vld [vmem:[#allocation7 + $0xa0] sm:$0xff] }
 0xc5d   : > { %v2022_v14 = vmul.f32 1.442695, %v2021_v13 }
 0xc5f   : > { %4972 = vpow2.f32 %v2022_v14 }
 0xc6c   : > { %v4973_v15 = vpop.eup %4972 }
 0xc6d   : > { %v2024_v16 = vsel %vm628_vm2, %v4973_v15, 0.0 }
 0xc6e   : > { %2025 = vadd.xlane.f32.xlu1 %v2024_v16 }
 0xcf7   : > { %v2026_v21 = vpop.xlane.xlu1 %2025 }
 0xcf8   : > { %4974 = vrcp.f32 %v2026_v21 }
 0xd05   : > { %v4975_v22 = vpop.eup %4974 }
 0xd06   : > { %v2028_v23 = vmul.f32 %v4975_v22, %v4973_v15 }
 0xd08   : > { %4640 = vmatmul.mubr.msk.f32.vlgmr.msra.gmra.mxu1 %vm628_vm2, %v2028_v23 }
 0xd09   : > { %4661 = vmatprep.mubr.msk.f32.mxu1 %vm5207_vm0, %v5206_v0  ;;  %4654 = vmatpush3.msra.mxu1 %v2185_v24 }
 0xd0a   : > { %4655 = vmatprep.subr.mxu1 %v5206_v0 }
 0xd0b   : > { %4656 = vmatpush3.msra.mxu1 %v2184_v25 }
 0xd0c   : > { %4657 = vmatprep.subr.mxu1 %v5206_v0 }
 0xd0d   : > { %4658 = vmatpush3.msra.mxu1 %v2183_v26 }
 0xd0e   : > { %4659 = vmatprep.subr.mxu1 %v5206_v0 }
 0xd0f   : > { %4660 = vmatpush3.msra.mxu1 %v2182_v27 }
 0xd10   : > { %4662 = vmatmul.mubr.msk.f32.vlgmr.msra.gmra.mxu1 %vm330_vm1, %v5439_v9  ;;  %4675 = vmatprep.subr.mxu1 %v5206_v0 }
 0xd11   : > { %4683 = vmatprep.mubr.msk.f32.mxu1 %vm5207_vm0, %v5206_v0  ;;  %4676 = vmatpush3.msra.mxu1 %v2335_v41  ;;  %v5707_v41 = vld [vmem:[%s5414_s1] sm:$0xff] }
 0xd12   : > { %4677 = vmatprep.subr.mxu1 %v5206_v0 }
 0xd13   : > { %4678 = vmatpush3.msra.mxu1 %v2334_v42  ;;  %v3188_v42 = vld [vmem:[#allocation7 + $0xd8] sm:$0xff] }
 0xd14   : > { %4679 = vmatprep.subr.mxu1 %v5206_v0 }
 0xd15   : > { %4680 = vmatpush3.msra.mxu1 %v2333_v43 }
 0xd16   : > { %4681 = vmatprep.subr.mxu1 %v5206_v0 }
 0xd17   : > { %4682 = vmatpush3.msra.mxu1 %v2332_v44  ;;  %v3187_v44 = vld [vmem:[#allocation7 + $0xd0] sm:$0xff] }
 0xd18   : > { %4684 = vmatmul.mubr.msk.f32.vlgmr.msra.gmra.mxu1 %vm330_vm1, %v5439_v9  ;;  %4691 = vmatprep.subr.mxu1 %v5206_v0 }
 0xd19   : > { %4693 = vmatprep.mubr.msk.f32.mxu1 %vm5207_vm0, %v5206_v0 }
 0xdc8   : > { %v2098_v29 = vpop.f32.mrf.mxu1 }
 0xdc9   : > { %4651 = vmatmul.mubr.msk.f32.vlgmr.msra.gmra.mxu0 %vm330_vm1, %v2098_v29 }
 0xdca   : > { %4665 = vmatpush3.msra.mxu0 %v2260_v28  ;;  %v4641_v31 = vpop.f32.mrf.mxu1  ;;  %4672 = vmatprep.mubr.msk.f32.mxu0 %vm5207_vm0, %v5206_v0 }
 0xdcb   : > { %4666 = vmatprep.subr.mxu0 %v5206_v0  ;;  %v3033_v31 = vld [vmem:[#allocation10 + $0xb0] sm:$0xff] }
 0xdcc   : > { %4667 = vmatpush3.msra.mxu0 %v2259_v30  ;;  %v3034_v30 = vld [vmem:[#allocation10 + $0xb8] sm:$0xff] }
 0xdcd   : > { %4668 = vmatprep.subr.mxu0 %v5206_v0 }
 0xdce   : > { %4669 = vmatpush3.msra.mxu0 %v2258_v32  ;;  %v3032_v32 = vld [vmem:[#allocation10 + $0xa8] sm:$0xff] }
 0xdcf   : > { %4670 = vmatprep.subr.mxu0 %v5206_v0 }
 0xdd0   : > { %4671 = vmatpush3.msra.mxu0 %v2257_v33  ;;  %v2252_v34 = vpop.f32.mrf.mxu1  ;;  %v3031_v33 = vld [vmem:[#allocation10 + $0xa0] sm:$0xff] }
 0xdd1   : > { %4673 = vmatmul.mubr.msk.f32.vlgmr.msra.gmra.mxu0 %vm330_vm1, %v5439_v9  ;;  %4686 = vmatprep.subr.mxu0 %v5206_v0 }
 0xdd2   : > { %4688 = vmatprep.mubr.msk.f32.mxu0 %vm5207_vm0, %v5206_v0  ;;  %v4663_v35 = vpop.f32.mrf.mxu1 }
 0xdd8   : > { %v2402_v53 = vpop.f32.mrf.mxu1 }
 0xdd9   : > { %4692 = vmatpush3.msra.mxu1 %v2402_v53 }
 0xdda   : > { %v4685_v54 = vpop.f32.mrf.mxu1  ;;  %4707 = vmatprep.subr.mxu1 %v5206_v0 }
 0xe89   : > { %v2176_v36 = vpop.f32.mrf.mxu0 }
 0xe8a   : > { %v5633_v37 = vadd.f32 %v2176_v36, %v5596_v2  ;;  %v2646_v2 = vld [vmem:[#allocation5 + $0xa0] sm:$0xff] }
 0xe8b   : > { %v4652_v38 = vpop.f32.mrf.mxu0 }
 0xe8c   : > { %v3112_v38 = vld [vmem:[#allocation5 + $0xd0] sm:$0xff] }
 0xe91   : > { %v2327_v39 = vpop.f32.mrf.mxu0 }
 0xe92   : > { %4687 = vmatpush3.xpose.msk.msra.mxu0 %vm330_vm1, %v2327_v39  ;;  %v3111_v39 = vld [vmem:[#allocation5 + $0xc8] sm:$0xff] }
 0xe93   : > { %v4674_v40 = vpop.f32.mrf.mxu0  ;;  %4696 = vmatprep.subr.mxu0 %v5206_v0 }
 0xe94   : > { %v3110_v40 = vld [vmem:[#allocation5 + $0xc0] sm:$0xff] }
 0xe95   : > { %4689 = vmatmul.mubr.msk.f32.vlgmr.msra.gmra.mxu0 %vm330_vm1, %v2252_v34 }
 0xe96   : > { %4704 = vmatprep.mubr.msk.f32.mxu0 %vm5207_vm0, %v5206_v0  ;;  %4697 = vmatpush3.msra.mxu0 %v2570_v55  ;;  %v3263_v55 = vld [vmem:[#allocation8 + $0xd8] sm:$0xff] }
 0xe97   : > { %4698 = vmatprep.subr.mxu0 %v5206_v0 }
 0xe98   : > { %4699 = vmatpush3.msra.mxu0 %v2569_v56  ;;  %v3262_v56 = vld [vmem:[#allocation8 + $0xd0] sm:$0xff] }
 0xe99   : > { %4700 = vmatprep.subr.mxu0 %v5206_v0 }
 0xe9a   : > { %4701 = vmatpush3.msra.mxu0 %v2568_v57  ;;  %v3261_v57 = vld [vmem:[#allocation8 + $0xc8] sm:$0xff] }
 0xe9b   : > { %4702 = vmatprep.subr.mxu0 %v5206_v0 }
 0xe9c   : > { %4703 = vmatpush3.msra.mxu0 %v2567_v58  ;;  %v3260_v58 = vld [vmem:[#allocation8 + $0xc0] sm:$0xff] }
 0xe9d   : > { %4718 = vmatprep.subr.mxu0 %v5206_v0 }
 0xf55   : > { %v2478_v45 = vpop.f32.mrf.mxu0 }
 0xf56   : > { %v2482_v46 = vsel %vm628_vm2, %v2478_v45, -inf }
 0xf57   : > { %2483 = vmax.xlane.f32.xlu0 %v2482_v46  ;;  %v4690_v47 = vpop.f32.mrf.mxu0  ;;  %v3186_v46 = vld [vmem:[#allocation7 + $0xc8] sm:$0xff] }
 0xf58   : > { %v3185_v47 = vld [vmem:[#allocation7 + $0xc0] sm:$0xff] }
 0xfe0   : > { %v2484_v48 = vpop.xlane.xlu0 %2483 }
 0xfe1   : > { %v2485_v49 = vsub.f32 %v2478_v45, %v2484_v48 }
 0xfe3   : > { %v2486_v50 = vmul.f32 1.442695, %v2485_v49 }
 0xfe5   : > { %4976 = vpow2.f32 %v2486_v50 }
 0xff2   : > { %v4977_v51 = vpop.eup %4976 }
 0xff3   : > { %v2488_v52 = vsel %vm628_vm2, %v4977_v51, 0.0 }
 0xff4   : > { %2489 = vadd.xlane.f32.xlu1 %v2488_v52 }
0x107d   : > { %v2490_v59 = vpop.xlane.xlu1 %2489 }
0x107e   : > { %4978 = vrcp.f32 %v2490_v59 }
0x108b   : > { %v4979_v60 = vpop.eup %4978 }
0x108c   : > { %v2492_v61 = vmul.f32 %v4979_v60, %v4977_v51 }
0x108e   : > { %4694 = vmatmul.mubr.msk.f32.vlgmr.msra.gmra.mxu1 %vm628_vm2, %v2492_v61 }
0x108f   : > { %4715 = vmatprep.mubr.msk.f32.mxu1 %vm5207_vm0, %v5206_v0  ;;  %4708 = vmatpush3.msra.mxu1 %v2649_v62 }
0x1090   : > { %4709 = vmatprep.subr.mxu1 %v5206_v0 }
0x1091   : > { %4710 = vmatpush3.msra.mxu1 %v2648_v63 }
0x1092   : > { %4711 = vmatprep.subr.mxu1 %v5206_v0 }
0x1093   : > { %4712 = vmatpush3.msra.mxu1 %v2647_v1 }
0x1094   : > { %4713 = vmatprep.subr.mxu1 %v5206_v0 }
0x1095   : > { %4714 = vmatpush3.msra.mxu1 %v2646_v2 }
0x1096   : > { %4716 = vmatmul.mubr.msk.f32.vlgmr.msra.gmra.mxu1 %vm330_vm1, %v5439_v9  ;;  %4729 = vmatprep.subr.mxu1 %v5206_v0 }
0x1097   : > { %4737 = vmatprep.mubr.msk.f32.mxu1 %vm5207_vm0, %v5206_v0  ;;  %4730 = vmatpush3.msra.mxu1 %v2799_v17  ;;  %v3574_v17 = vld [vmem:[#allocation5 + $0xe0] sm:$0xff] }
0x1098   : > { %4731 = vmatprep.subr.mxu1 %v5206_v0 }
0x1099   : > { %4732 = vmatpush3.msra.mxu1 %v2798_v18  ;;  %v3652_v18 = vld [vmem:[#allocation7 + $0xf8] sm:$0xff] }
0x109a   : > { %4733 = vmatprep.subr.mxu1 %v5206_v0 }
0x109b   : > { %4734 = vmatpush3.msra.mxu1 %v2797_v19 }
0x109c   : > { %4735 = vmatprep.subr.mxu1 %v5206_v0 }
0x109d   : > { %4736 = vmatpush3.msra.mxu1 %v2796_v20  ;;  %v3651_v20 = vld [vmem:[#allocation7 + $0xf0] sm:$0xff] }
0x109e   : > { %4738 = vmatmul.mubr.msk.f32.vlgmr.msra.gmra.mxu1 %vm330_vm1, %v5439_v9  ;;  %4745 = vmatprep.subr.mxu1 %v5206_v0 }
0x109f   : > { %4747 = vmatprep.mubr.msk.f32.mxu1 %vm5207_vm0, %v5206_v0 }
0x114e   : > { %v2562_v4 = vpop.f32.mrf.mxu1 }
0x114f   : > { %4705 = vmatmul.mubr.msk.f32.vlgmr.msra.gmra.mxu0 %vm330_vm1, %v2562_v4 }
0x1150   : > { %4719 = vmatpush3.msra.mxu0 %v2724_v3  ;;  %v4695_v6 = vpop.f32.mrf.mxu1  ;;  %4726 = vmatprep.mubr.msk.f32.mxu0 %vm5207_vm0, %v5206_v0 }
0x1151   : > { %4720 = vmatprep.subr.mxu0 %v5206_v0  ;;  %v3498_v6 = vld [vmem:[#allocation10 + $0xd8] sm:$0xff] }
0x1152   : > { %4721 = vmatpush3.msra.mxu0 %v2723_v5 }
0x1153   : > { %4722 = vmatprep.subr.mxu0 %v5206_v0 }
0x1154   : > { %4723 = vmatpush3.msra.mxu0 %v2722_v7  ;;  %v3497_v7 = vld [vmem:[#allocation10 + $0xd0] sm:$0xff] }
0x1155   : > { %4724 = vmatprep.subr.mxu0 %v5206_v0 }
0x1156   : > { %4725 = vmatpush3.msra.mxu0 %v2721_v8  ;;  %v2716_v10 = vpop.f32.mrf.mxu1  ;;  %v3496_v8 = vld [vmem:[#allocation10 + $0xc8] sm:$0xff] }
0x1157   : > { %4727 = vmatmul.mubr.msk.f32.vlgmr.msra.gmra.mxu0 %vm330_vm1, %v5439_v9  ;;  %4740 = vmatprep.subr.mxu0 %v5206_v0 }
0x1158   : > { %4742 = vmatprep.mubr.msk.f32.mxu0 %vm5207_vm0, %v5206_v0  ;;  %v4717_v11 = vpop.f32.mrf.mxu1 }
0x115e   : > { %v2866_v29 = vpop.f32.mrf.mxu1 }
0x115f   : > { %4746 = vmatpush3.msra.mxu1 %v2866_v29 }
0x1160   : > { %v4739_v9 = vpop.f32.mrf.mxu1  ;;  %4761 = vmatprep.subr.mxu1 %v5206_v0 }
0x120f   : > { %v2640_v12 = vpop.f32.mrf.mxu0 }
0x1210   : > { %v5678_v13 = vadd.f32 %v2640_v12, %v5633_v37  ;;  %v3113_v37 = vld [vmem:[#allocation5 + $0xd8] sm:$0xff] }
0x1211   : > { %v4706_v14 = vpop.f32.mrf.mxu0 }
0x1212   : > { %v3577_v14 = vld [vmem:[#allocation5 + $0xf8] sm:$0xff] }
0x1217   : > { %v2791_v15 = vpop.f32.mrf.mxu0 }
0x1218   : > { %4741 = vmatpush3.xpose.msk.msra.mxu0 %vm330_vm1, %v2791_v15  ;;  %v3576_v15 = vld [vmem:[#allocation5 + $0xf0] sm:$0xff] }
0x1219   : > { %v4728_v16 = vpop.f32.mrf.mxu0  ;;  %4750 = vmatprep.subr.mxu0 %v5206_v0 }
0x121a   : > { %v3575_v16 = vld [vmem:[#allocation5 + $0xe8] sm:$0xff] }
0x121b   : > { %4743 = vmatmul.mubr.msk.f32.vlgmr.msra.gmra.mxu0 %vm330_vm1, %v2716_v10  ;;  %v3495_v10 = vld [vmem:[#allocation10 + $0xc0] sm:$0xff] }
0x121c   : > { %4758 = vmatprep.mubr.msk.f32.mxu0 %vm5207_vm0, %v5206_v0  ;;  %4751 = vmatpush3.msra.mxu0 %v3034_v30  ;;  %v3727_v30 = vld [vmem:[#allocation8 + $0xf8] sm:$0xff] }
0x121d   : > { %4752 = vmatprep.subr.mxu0 %v5206_v0 }
0x121e   : > { %4753 = vmatpush3.msra.mxu0 %v3033_v31  ;;  %v3726_v31 = vld [vmem:[#allocation8 + $0xf0] sm:$0xff] }
0x121f   : > { %4754 = vmatprep.subr.mxu0 %v5206_v0 }
0x1220   : > { %4755 = vmatpush3.msra.mxu0 %v3032_v32  ;;  %v3725_v32 = vld [vmem:[#allocation8 + $0xe8] sm:$0xff] }
0x1221   : > { %4756 = vmatprep.subr.mxu0 %v5206_v0 }
0x1222   : > { %4757 = vmatpush3.msra.mxu0 %v3031_v33  ;;  %v3724_v33 = vld [vmem:[#allocation8 + $0xe0] sm:$0xff] }
0x1223   : > { %4772 = vmatprep.subr.mxu0 %v5206_v0 }
0x12db   : > { %v2942_v21 = vpop.f32.mrf.mxu0 }
0x12dc   : > { %v2946_v22 = vsel %vm628_vm2, %v2942_v21, -inf }
0x12dd   : > { %2947 = vmax.xlane.f32.xlu0 %v2946_v22  ;;  %v4744_v23 = vpop.f32.mrf.mxu0  ;;  %v3650_v22 = vld [vmem:[#allocation7 + $0xe8] sm:$0xff] }
0x12de   : > { %v3649_v23 = vld [vmem:[#allocation7 + $0xe0] sm:$0xff] }
0x1366   : > { %v2948_v24 = vpop.xlane.xlu0 %2947 }
0x1367   : > { %v2949_v25 = vsub.f32 %v2942_v21, %v2948_v24 }
0x1369   : > { %v2950_v26 = vmul.f32 1.442695, %v2949_v25 }
0x136b   : > { %4980 = vpow2.f32 %v2950_v26 }
0x1378   : > { %v4981_v27 = vpop.eup %4980 }
0x1379   : > { %v2952_v28 = vsel %vm628_vm2, %v4981_v27, 0.0 }
0x137a   : > { %2953 = vadd.xlane.f32.xlu1 %v2952_v28 }
0x1403   : > { %v2954_v34 = vpop.xlane.xlu1 %2953 }
0x1404   : > { %4982 = vrcp.f32 %v2954_v34 }
0x1411   : > { %v4983_v35 = vpop.eup %4982 }
0x1412   : > { %v2956_v36 = vmul.f32 %v4983_v35, %v4981_v27 }
0x1414   : > { %4748 = vmatmul.mubr.msk.f32.vlgmr.msra.gmra.mxu1 %vm628_vm2, %v2956_v36 }
0x1415   : > { %4769 = vmatprep.mubr.msk.f32.mxu1 %vm5207_vm0, %v5206_v0  ;;  %4762 = vmatpush3.msra.mxu1 %v3113_v37 }
0x1416   : > { %4763 = vmatprep.subr.mxu1 %v5206_v0 }
0x1417   : > { %4764 = vmatpush3.msra.mxu1 %v3112_v38 }
0x1418   : > { %4765 = vmatprep.subr.mxu1 %v5206_v0 }
0x1419   : > { %4766 = vmatpush3.msra.mxu1 %v3111_v39 }
0x141a   : > { %4767 = vmatprep.subr.mxu1 %v5206_v0 }
0x141b   : > { %4768 = vmatpush3.msra.mxu1 %v3110_v40 }
0x141c   : > { %4770 = vmatmul.mubr.msk.f32.vlgmr.msra.gmra.mxu1 %vm330_vm1, %v5707_v41  ;;  %4783 = vmatprep.subr.mxu1 %v5206_v0 }
0x141d   : > { %4791 = vmatprep.mubr.msk.f32.mxu1 %vm5207_vm0, %v5206_v0  ;;  %4784 = vmatpush3.msra.mxu1 %v3263_v55 }
0x141e   : > { %4785 = vmatprep.subr.mxu1 %v5206_v0 }
0x141f   : > { %4786 = vmatpush3.msra.mxu1 %v3262_v56 }
0x1420   : > { %4787 = vmatprep.subr.mxu1 %v5206_v0 }
0x1421   : > { %4788 = vmatpush3.msra.mxu1 %v3261_v57 }
0x1422   : > { %4789 = vmatprep.subr.mxu1 %v5206_v0 }
0x1423   : > { %4790 = vmatpush3.msra.mxu1 %v3260_v58 }
0x1424   : > { %4792 = vmatmul.mubr.msk.f32.vlgmr.msra.gmra.mxu1 %vm330_vm1, %v5707_v41  ;;  %4799 = vmatprep.subr.mxu1 %v5206_v0 }
0x1425   : > { %4801 = vmatprep.mubr.msk.f32.mxu1 %vm5207_vm0, %v5206_v0 }
0x14d4   : > { %v3026_v43 = vpop.f32.mrf.mxu1 }
0x14d5   : > { %4759 = vmatmul.mubr.msk.f32.vlgmr.msra.gmra.mxu0 %vm330_vm1, %v3026_v43 }
0x14d6   : > { %4773 = vmatpush3.msra.mxu0 %v3188_v42  ;;  %v4749_v45 = vpop.f32.mrf.mxu1  ;;  %4780 = vmatprep.mubr.msk.f32.mxu0 %vm5207_vm0, %v5206_v0 }
0x14d7   : > { %4774 = vmatprep.subr.mxu0 %v5206_v0  ;;  %v3961_v45 = vld [vmem:[#allocation10 + $0xf0] sm:$0xff] }
0x14d8   : > { %4775 = vmatpush3.msra.mxu0 %v3187_v44  ;;  %v3962_v44 = vld [vmem:[#allocation10 + $0xf8] sm:$0xff] }
0x14d9   : > { %4776 = vmatprep.subr.mxu0 %v5206_v0 }
0x14da   : > { %4777 = vmatpush3.msra.mxu0 %v3186_v46  ;;  %v3960_v46 = vld [vmem:[#allocation10 + $0xe8] sm:$0xff] }
0x14db   : > { %4778 = vmatprep.subr.mxu0 %v5206_v0 }
0x14dc   : > { %4779 = vmatpush3.msra.mxu0 %v3185_v47  ;;  %v3180_v48 = vpop.f32.mrf.mxu1 }
0x14dd   : > { %4781 = vmatmul.mubr.msk.f32.vlgmr.msra.gmra.mxu0 %vm330_vm1, %v5707_v41  ;;  %4794 = vmatprep.subr.mxu0 %v5206_v0 }
0x14de   : > { %4796 = vmatprep.mubr.msk.f32.mxu0 %vm5207_vm0, %v5206_v0  ;;  %v4771_v49 = vpop.f32.mrf.mxu1 }
0x14e4   : > { %v3330_v4 = vpop.f32.mrf.mxu1 }
0x14e5   : > { %4800 = vmatpush3.msra.mxu1 %v3330_v4 }
0x14e6   : > { %v4793_v5 = vpop.f32.mrf.mxu1  ;;  %4815 = vmatprep.subr.mxu1 %v5206_v0 }
0x1595   : > { %v3104_v50 = vpop.f32.mrf.mxu0 }
0x1596   : > { %v5726_v51 = vadd.f32 %v3104_v50, %v5678_v13  ;;  %v3959_v50 = vld [vmem:[#allocation10 + $0xe0] sm:$0xff] }
0x1597   : > { %v4760_v52 = vpop.f32.mrf.mxu0 }
0x159d   : > { %v3255_v53 = vpop.f32.mrf.mxu0 }
0x159e   : > { %4795 = vmatpush3.xpose.msk.msra.mxu0 %vm330_vm1, %v3255_v53 }
0x159f   : > { %v4782_v54 = vpop.f32.mrf.mxu0  ;;  %4804 = vmatprep.subr.mxu0 %v5206_v0 }
0x15a0   : > { %v4240_v54 = vld [vmem:[%s5837_s5] ss:$0 sm:$0xff] }
0x15a1   : > { %4797 = vmatmul.mubr.msk.f32.vlgmr.msra.gmra.mxu0 %vm330_vm1, %v3180_v48 }
0x15a2   : > { %4812 = vmatprep.mubr.msk.f32.mxu0 %vm5207_vm0, %v5206_v0  ;;  %4805 = vmatpush3.msra.mxu0 %v3498_v6 }
0x15a3   : > { %4806 = vmatprep.subr.mxu0 %v5206_v0 }
0x15a4   : > { %4807 = vmatpush3.msra.mxu0 %v3497_v7 }
0x15a5   : > { %4808 = vmatprep.subr.mxu0 %v5206_v0 }
0x15a6   : > { %4809 = vmatpush3.msra.mxu0 %v3496_v8 }
0x15a7   : > { %4810 = vmatprep.subr.mxu0 %v5206_v0 }
0x15a8   : > { %4811 = vmatpush3.msra.mxu0 %v3495_v10 }
0x15a9   : > { %4826 = vmatprep.subr.mxu0 %v5206_v0 }
0x1661   : > { %v3406_v59 = vpop.f32.mrf.mxu0 }
0x1662   : > { %v3410_v60 = vsel %vm628_vm2, %v3406_v59, -inf }
0x1663   : > { %3411 = vmax.xlane.f32.xlu0 %v3410_v60  ;;  %v4798_v61 = vpop.f32.mrf.mxu0 }
0x16ec   : > { %v3412_v62 = vpop.xlane.xlu0 %3411 }
0x16ed   : > { %v3413_v63 = vsub.f32 %v3406_v59, %v3412_v62 }
0x16ef   : > { %v3414_v1 = vmul.f32 1.442695, %v3413_v63 }
0x16f1   : > { %4984 = vpow2.f32 %v3414_v1 }
0x16fe   : > { %v4985_v2 = vpop.eup %4984 }
0x16ff   : > { %v3416_v3 = vsel %vm628_vm2, %v4985_v2, 0.0 }
0x1700   : > { %3417 = vadd.xlane.f32.xlu1 %v3416_v3 }
0x1789   : > { %v3418_v11 = vpop.xlane.xlu1 %3417 }
0x178a   : > { %4986 = vrcp.f32 %v3418_v11 }
0x1797   : > { %v4987_v12 = vpop.eup %4986 }
0x1798   : > { %v3420_v13 = vmul.f32 %v4987_v12, %v4985_v2 }
0x179a   : > { %4802 = vmatmul.mubr.msk.f32.vlgmr.msra.gmra.mxu1 %vm628_vm2, %v3420_v13 }
0x179b   : > { %4823 = vmatprep.mubr.msk.f32.mxu1 %vm5207_vm0, %v5206_v0  ;;  %4816 = vmatpush3.msra.mxu1 %v3577_v14 }
0x179c   : > { %4817 = vmatprep.subr.mxu1 %v5206_v0 }
0x179d   : > { %4818 = vmatpush3.msra.mxu1 %v3576_v15 }
0x179e   : > { %4819 = vmatprep.subr.mxu1 %v5206_v0 }
0x179f   : > { %4820 = vmatpush3.msra.mxu1 %v3575_v16 }
0x17a0   : > { %4821 = vmatprep.subr.mxu1 %v5206_v0 }
0x17a1   : > { %4822 = vmatpush3.msra.mxu1 %v3574_v17 }
0x17a2   : > { %4824 = vmatmul.mubr.msk.f32.vlgmr.msra.gmra.mxu1 %vm330_vm1, %v5707_v41  ;;  %4837 = vmatprep.subr.mxu1 %v5206_v0 }
0x17a3   : > { %4845 = vmatprep.mubr.msk.f32.mxu1 %vm5207_vm0, %v5206_v0  ;;  %4838 = vmatpush3.msra.mxu1 %v3727_v30 }
0x17a4   : > { %4839 = vmatprep.subr.mxu1 %v5206_v0 }
0x17a5   : > { %4840 = vmatpush3.msra.mxu1 %v3726_v31 }
0x17a6   : > { %4841 = vmatprep.subr.mxu1 %v5206_v0 }
0x17a7   : > { %4842 = vmatpush3.msra.mxu1 %v3725_v32 }
0x17a8   : > { %4843 = vmatprep.subr.mxu1 %v5206_v0 }
0x17a9   : > { %4844 = vmatpush3.msra.mxu1 %v3724_v33 }
0x17aa   : > { %4846 = vmatmul.mubr.msk.f32.vlgmr.msra.gmra.mxu1 %vm330_vm1, %v5707_v41  ;;  %4853 = vmatprep.subr.mxu1 %v5206_v0 }
0x17ab   : > { %4855 = vmatprep.mubr.msk.f32.mxu1 %vm5207_vm0, %v5206_v0 }
0x185a   : > { %v3490_v19 = vpop.f32.mrf.mxu1 }
0x185b   : > { %4813 = vmatmul.mubr.msk.f32.vlgmr.msra.gmra.mxu0 %vm330_vm1, %v3490_v19 }
0x185c   : > { %4827 = vmatpush3.msra.mxu0 %v3652_v18  ;;  %v4803_v21 = vpop.f32.mrf.mxu1  ;;  %4834 = vmatprep.mubr.msk.f32.mxu0 %vm5207_vm0, %v5206_v0 }
0x185d   : > { %4828 = vmatprep.subr.mxu0 %v5206_v0 }
0x185e   : > { %4829 = vmatpush3.msra.mxu0 %v3651_v20 }
0x185f   : > { %4830 = vmatprep.subr.mxu0 %v5206_v0 }
0x1860   : > { %4831 = vmatpush3.msra.mxu0 %v3650_v22 }
0x1861   : > { %4832 = vmatprep.subr.mxu0 %v5206_v0 }
0x1862   : > { %4833 = vmatpush3.msra.mxu0 %v3649_v23  ;;  %v3644_v24 = vpop.f32.mrf.mxu1 }
0x1863   : > { %4835 = vmatmul.mubr.msk.f32.vlgmr.msra.gmra.mxu0 %vm330_vm1, %v5707_v41  ;;  %4848 = vmatprep.subr.mxu0 %v5206_v0 }
0x1864   : > { %4850 = vmatprep.mubr.msk.f32.mxu0 %vm5207_vm0, %v5206_v0  ;;  %v4825_v25 = vpop.f32.mrf.mxu1 }
0x186a   : > { %v3794_v43 = vpop.f32.mrf.mxu1 }
0x186b   : > { %4854 = vmatpush3.msra.mxu1 %v3794_v43 }
0x186c   : > { %v4847_v41 = vpop.f32.mrf.mxu1 }
0x191b   : > { %v3568_v26 = vpop.f32.mrf.mxu0 }
0x191c   : > { %v3572_v27 = vadd.f32 %v3568_v26, %v5726_v51 }
0x191d   : > { %v4814_v28 = vpop.f32.mrf.mxu0 }
0x1923   : > { %v3719_v29 = vpop.f32.mrf.mxu0 }
0x1924   : > { %4849 = vmatpush3.xpose.msk.msra.mxu0 %vm330_vm1, %v3719_v29 }
0x1925   : > { %v4836_v9 = vpop.f32.mrf.mxu0  ;;  %4858 = vmatprep.subr.mxu0 %v5206_v0 }
0x1927   : > { %4851 = vmatmul.mubr.msk.f32.vlgmr.msra.gmra.mxu0 %vm330_vm1, %v3644_v24 }
0x1928   : > { %4866 = vmatprep.mubr.msk.f32.mxu0 %vm5207_vm0, %v5206_v0  ;;  %4859 = vmatpush3.msra.mxu0 %v3962_v44 }
0x1929   : > { %4860 = vmatprep.subr.mxu0 %v5206_v0 }
0x192a   : > { %4861 = vmatpush3.msra.mxu0 %v3961_v45 }
0x192b   : > { %4862 = vmatprep.subr.mxu0 %v5206_v0 }
0x192c   : > { %4863 = vmatpush3.msra.mxu0 %v3960_v46 }
0x192d   : > { %4864 = vmatprep.subr.mxu0 %v5206_v0 }
0x192e   : > { %4865 = vmatpush3.msra.mxu0 %v3959_v50 }
0x19e7   : > { %v3870_v34 = vpop.f32.mrf.mxu0 }
0x19e8   : > { %v3874_v35 = vsel %vm628_vm2, %v3870_v34, -inf }
0x19e9   : > { %3875 = vmax.xlane.f32.xlu0 %v3874_v35  ;;  %v4852_v36 = vpop.f32.mrf.mxu0 }
0x1a72   : > { %v3876_v37 = vpop.xlane.xlu0 %3875 }
0x1a73   : > { %v3877_v38 = vsub.f32 %v3870_v34, %v3876_v37 }
0x1a75   : > { %v3878_v39 = vmul.f32 1.442695, %v3877_v38 }
0x1a77   : > { %4988 = vpow2.f32 %v3878_v39 }
0x1a84   : > { %v4989_v40 = vpop.eup %4988 }
0x1a85   : > { %v3880_v42 = vsel %vm628_vm2, %v4989_v40, 0.0 }
0x1a86   : > { %3881 = vadd.xlane.f32.xlu1 %v3880_v42 }
0x1b0f   : > { %v3882_v47 = vpop.xlane.xlu1 %3881 }
0x1b10   : > { %4990 = vrcp.f32 %v3882_v47 }
0x1b1d   : > { %v4991_v48 = vpop.eup %4990 }
0x1b1e   : > { %v3884_v49 = vmul.f32 %v4991_v48, %v4989_v40 }
0x1b20   : > { %4856 = vmatmul.mubr.msk.f32.vlgmr.msra.gmra.mxu1 %vm628_vm2, %v3884_v49 }
0x1be0   : > { %v3954_v51 = vpop.f32.mrf.mxu1 }
0x1be1   : > { %4867 = vmatmul.mubr.msk.f32.vlgmr.msra.gmra.mxu0 %vm330_vm1, %v3954_v51 }
0x1be2   : > { %v4857_v52 = vpop.f32.mrf.mxu1 }
0x1ca1   : > { %v4032_v53 = vpop.f32.mrf.mxu0 }
0x1ca2   : > { %v4036_v0 = vadd.f32 %v4032_v53, %v3572_v27 }
0x1ca3   : > { %v4868_v55 = vpop.f32.mrf.mxu0 }
0x1ca4   : > { %v4044_v56 = vadd.f32 %v4240_v54, %v4036_v0 }
0x1ca6   : > { %4045 = vst.msk [vmem:[%s324_s30] sm:$0xff] %vm330_vm1, %v4044_v56 }
0x1ca7   : > { %5138 = shalt.err (!%p5135_p11)
}
0x1ca8   : > { %s5139_s13 = scalar_lea.hbm %s4058_s18, 128  ;;  %s5143_s1 = scalar_lea.hbm %s5838_s6, 256 }
0x1ca9   : > { %p5140_p13 = scmp.ne.s32.totalorder %s4058_s18, %s5139_s13  ;;  %p5144_p4 = scmp.lt.s32.totalorder %s4058_s18, %s5838_s6 }
0x1caa   : > { %p5145_p6 = scmp.lt.s32.totalorder %s5143_s1, %s5139_s13 }
0x1cab   : > { %p5141_p1 = pnand %p5140_p13, %p5858_p7 }
0x1cac   : > { %p5146_p5 = por %p5145_p6, %p5144_p4 }
0x1cad   : > { %p5142_p3 = pneg %p5141_p1 }
0x1caf   : > { %p5147_p8 = pnand %p5146_p5, %p5142_p3 }
0x1cb1   : > { %5150 = shalt.err (!%p5147_p8)
}
0x1cb2   : > { %4887 = dma.vmem_to_hbm [thread:$0]  (%p5858_p7), %s4061_s8, 128, %s4058_s18, %s4047_s25  }
0x1cb3 PF: > { %s4072_s26 = sand.u32 1, %s5185_s21   ;;  %p5859_p10 = scmp.ne.s32.totalorder %s5850_s17, 0 }
0x1cb4   : > { %p5860_p0 = scmp.ge.s32.totalorder %s5197_s24, 2  ;;  %s4073_s30 = scalar_lea.sflag [#allocation4], %s4072_s26 }
0x1cb6   : > { %p4907_p12 = pnand %p5860_p0, %p5859_p10 }
0x1cb8   : > { %p4908_p2 = pneg %p4907_p12 }
0x1cba   : > { %5180 = dma.done.wait (%p4908_p2), %s4073_s30, 128  }
0x1cbb   : > { %5182 = vsyncadd (%p4908_p2), %s4073_s30, 4294967168  ;;  %p21_p9 = scmp.ge.s32.totalorder %s5345_s9, 4   ;;  %s5861_s21 = smov %s5189_s22 }
0x1cbc   : > { %s5862_s22 = smov %s5193_s23  ;;  %s5863_s23 = smov %s5356_s14 }
0x1cbd   : > { %s5864_s24 = smov %s5345_s9  ;;  %23 = sbr.rel (!%p21_p9) target bundleno = 9 (0x9), region = 133 }
0x1cc2   :  { %4078 = vsyncpa [#allocation3], 1 }
0x1cc3   :  { %4080 = vsyncpa [#allocation3 + $0x1], 1 }
0x1cc4   :  { %4081 = vsyncpa [#allocation6], 1 }
0x1cc5   :  { %4082 = vsyncpa [#allocation9], 1 }
0x1cc6   :  { %4083 = vsyncpa [#allocation4], 1 }
0x1cc7   :  { %4085 = vsyncpa [#allocation4 + $0x1], 1 }

</bundles_post_ra>
